<compile_context>
chip_gen: v6e
topology: v6e:2x2x1
jax: 0.10.0
libtpu: 0.0.40
codegen_flags: <defaults>
</compile_context>

<pallas_src>
import functools

import jax
import jax.numpy as jnp
from jax import lax
from jax.experimental import pallas as pl
from jax.experimental.pallas import tpu as pltpu

# Set to jnp.bfloat16 on v6e / v7x to use the fast MXU path (accumulation stays f32 via
# preferred_element_type).  Keep f32 on v5e / when bit-matching the PyTorch reference.
_MXU_DTYPE = jnp.float32


def _m(a):
    return a.astype(_MXU_DTYPE)


def _softplus(x):
    # stable softplus with only exp/log (robust Mosaic lowering)
    return jnp.maximum(x, 0.0) + jnp.log(1.0 + jnp.exp(-jnp.abs(x)))


# ----------------------------- the fused kernel (one batch row per grid step) -----------------------------
def _fused_kernel(x_ref, wfx_ref, bfx_ref, wlogT_ref, blog_ref, win_ref, wdtT_ref,
                  convw_ref, convb_ref, dtb_row_ref, dtb_col_ref, a_row_ref, a_col_ref,
                  wfcdT_ref, d_row_ref, normw_ref, whout_ref, wto_ref, bto_ref, masks_ref,
                  o_ref,
                  sw_scr, st_scr, y_scr, ox_scr,
                  *, H, dh, G, inner, Di, Ds, Hh, P):
    f32 = jnp.float32
    N = x_ref.shape[1]
    L = G
    conv_dim = Di + 2 * Ds

    x = x_ref[0].astype(f32)                                               # (N, C)

    # ---------------- stage 1: value projection + composed slice logits (2 matmuls) --------------
    fx_all = jnp.dot(_m(x), _m(wfx_ref[...]),
                     preferred_element_type=f32) + bfx_ref[...]            # (N, inner)
    # logits^T for ALL heads at once (temperature already folded into W/b): (H*G, N), NT matmul
    logT = lax.dot_general(_m(wlogT_ref[...]), _m(x), (((1,), (1,)), ((), ())),
                           preferred_element_type=f32) + blog_ref[...]

    # ---------------- stage 2: per-head softmax over slices + slice tokens ------------------------
    for h in range(H):                                                     # static loop (H small)
        lg = logT[h * G:(h + 1) * G, :]                                    # (G, N)
        mx = jnp.max(lg, axis=0, keepdims=True)
        e = jnp.exp(lg - mx)
        sw = e / jnp.sum(e, axis=0, keepdims=True)                         # softmax over slices
        sw_scr[h] = sw                                                     # stash for deslice
        norm_col = jnp.sum(sw, axis=1, keepdims=True)                      # (G, 1) slice_norm
        tok = jnp.dot(_m(sw), _m(fx_all[:, h * dh:(h + 1) * dh]),
                      preferred_element_type=f32)                          # (G, dh)
        st_scr[:, h * dh:(h + 1) * dh] = tok / (norm_col + 1e-5)           # 'b h g c -> b g (h c)'

    st = st_scr[...]                                                       # (G, inner)

    # ---------------- stage 3: Hydra --------------------------------------------------------------
    rid = lax.broadcasted_iota(jnp.int32, (L, 1), 0)
    m_first = (rid > 0).astype(f32)                                        # zero row 0 after +1 roll
    m_last = (rid < L - 1).astype(f32)                                     # zero last row after -1 roll
    Lm = masks_ref[0]                                                      # lower-incl (t>=s)
    Um = masks_ref[1]                                                      # upper-incl (t<=s)

    zx = jnp.dot(_m(st), _m(win_ref[...]), preferred_element_type=f32)     # (L, d_in_proj)
    z = zx[:, :Di]
    xBC_raw = zx[:, Di:Di + conv_dim]
    dt_col = zx[:, Di + conv_dim:]                                         # (L, 2*Hh)

    # depthwise conv1d (k=3, 'same', zero pad) + SiLU; taps shifted via XLU roll + row mask
    w = convw_ref[...]                                                     # (3, conv_dim)
    xm1 = pltpu.roll(xBC_raw, shift=1, axis=0) * m_first                   # x[l-1]
    xp1 = pltpu.roll(xBC_raw, shift=L - 1, axis=0) * m_last                # x[l+1]
    yc = xm1 * w[0:1] + xBC_raw * w[1:2] + xp1 * w[2:3] + convb_ref[...]
    xBC = yc * jax.nn.sigmoid(yc)                                          # SiLU

    x_ssm = xBC[:, :Di]
    Bm = xBC[:, Di:Di + Ds]
    Cm = xBC[:, Di + Ds:]

    # C_t . B_s, shared across heads / directions
    CB = lax.dot_general(_m(Cm), _m(Bm), (((1,), (1,)), ((), ())),
                         preferred_element_type=f32)                       # (L, L)

    # diagonal coefficient fc_D(x) + D
    if Hh == 1:
        dcoef = jnp.sum(x_ssm * wfcdT_ref[...], axis=-1, keepdims=True)    # (L, 1) on the VPU
    else:
        dcoef = lax.dot_general(_m(x_ssm), _m(wfcdT_ref[...]), (((1,), (1,)), ((), ())),
                                preferred_element_type=f32)                # (L, Hh)
    dcoef = dcoef + d_row_ref[...]                                         # + D

    # dt in column (per-t) layout; cumsums batched over all heads & directions (2 matmuls)
    dt_c = _softplus(dt_col + dtb_row_ref[...])                            # (L, 2*Hh)
    adt_c = dt_c * a_row_ref[...]
    cs_c = jnp.dot(Lm, adt_c, preferred_element_type=f32)                  # fwd inclusive cumsum
    rcs_c = jnp.dot(Um, adt_c, preferred_element_type=f32)                 # rev inclusive cumsum

    # dt in row (per-s) layout: rebuilt in-kernel with a tiny NT matmul (no transposes)
    dt_r_raw = lax.dot_general(_m(wdtT_ref[...]), _m(st), (((1,), (1,)), ((), ())),
                               preferred_element_type=f32)                 # (2*Hh, L)
    dt_r = _softplus(dt_r_raw + dtb_col_ref[...])
    adt_r = dt_r * a_col_ref[...]
    cs_r = jnp.dot(adt_r, Um, preferred_element_type=f32)                  # (2*Hh, L)
    rcs_r = jnp.dot(adt_r, Lm, preferred_element_type=f32)

    for hh in range(Hh):                                                   # static loop
        diff_f = cs_c[:, hh:hh + 1] - cs_r[hh:hh + 1, :]                   # cs[t]-cs[s]
        diff_b = rcs_c[:, Hh + hh:Hh + hh + 1] - rcs_r[Hh + hh:Hh + hh + 1, :]
        # valid regions have diff <= 0 (A<0, dt>=0); clamp keeps the masked-out region finite
        dec_f = jnp.exp(jnp.minimum(diff_f, 0.0)) * Lm
        dec_b = jnp.exp(jnp.minimum(diff_b, 0.0)) * Um

        Mf = CB * dec_f * dt_r[hh:hh + 1, :]                               # dt[s] along columns
        Mb = CB * dec_b * dt_r[Hh + hh:Hh + hh + 1, :]
        x_h = x_ssm[:, hh * P:(hh + 1) * P]                                # (L, P)
        yf = jnp.dot(_m(Mf), _m(x_h), preferred_element_type=f32)
        yb = jnp.dot(_m(Mb), _m(x_h), preferred_element_type=f32)
        # quasiseparable shift-by-one: y[t] = yf[t-1] + yb[t+1] (XLU roll + row mask)
        y_ss = (pltpu.roll(yf, shift=1, axis=0) * m_first
                + pltpu.roll(yb, shift=L - 1, axis=0) * m_last)
        y_scr[:, hh * P:(hh + 1) * P] = y_ss + x_h * dcoef[:, hh:hh + 1]   # diagonal term

    y = y_scr[...]                                                         # (L, Di)

    # gated RMSNorm (gate then norm) + Hydra out projection
    v = y * (z * jax.nn.sigmoid(z))
    normed = v * lax.rsqrt(jnp.mean(v * v, axis=-1, keepdims=True) + 1e-5) * normw_ref[...]
    hyd = jnp.dot(_m(normed), _m(whout_ref[...]), preferred_element_type=f32)   # (L, inner)

    # ---------------- stage 4: deslice + to_out ----------------------------------------------------
    for h in range(H):
        sw = sw_scr[h]                                                     # (G, N)
        out_h = lax.dot_general(_m(sw), _m(hyd[:, h * dh:(h + 1) * dh]),
                                (((0,), (0,)), ((), ())),                  # contract over G
                                preferred_element_type=f32)                # (N, dh)
        ox_scr[:, h * dh:(h + 1) * dh] = out_h
    out = jnp.dot(_m(ox_scr[...]), _m(wto_ref[...]),
                  preferred_element_type=f32) + bto_ref[...]               # (N, dim)
    o_ref[0] = out.astype(o_ref.dtype)


# ----------------------------- wrapper -----------------------------
def _const_spec(a):
    nd = a.ndim
    return pl.BlockSpec(a.shape, lambda b: (0,) * nd)


def latent_ssm_forward(x, pp):
    """x: (B, N, C) -> (B, N, C).  pp: output of prepare_params()."""
    B, N, C = x.shape
    H, dh, G = pp['H'], pp['dh'], pp['G']
    inner, Di, Ds, Hh, P, dim = pp['inner'], pp['Di'], pp['Ds'], pp['Hh'], pp['P'], pp['dim']

    consts = [pp['W_fx'], pp['b_fx'], pp['WlogT'], pp['blog'], pp['W_in'], pp['WdtT'],
              pp['conv_w'], pp['conv_b'], pp['dtb_row'], pp['dtb_col'], pp['A_row'],
              pp['A_col'], pp['wfcdT'], pp['D_row'], pp['norm_w'], pp['W_hout'],
              pp['W_toout'], pp['b_toout'], pp['masks']]

    kernel = functools.partial(_fused_kernel, H=H, dh=dh, G=G, inner=inner,
                               Di=Di, Ds=Ds, Hh=Hh, P=P)

    return pl.pallas_call(
        kernel,
        out_shape=jax.ShapeDtypeStruct((B, N, dim), x.dtype),
        grid=(B,),
        in_specs=[pl.BlockSpec((1, N, C), lambda b: (b, 0, 0))] + [_const_spec(a) for a in consts],
        out_specs=pl.BlockSpec((1, N, dim), lambda b: (b, 0, 0)),
        scratch_shapes=[
            pltpu.VMEM((H, G, N), jnp.float32),    # slice weights (transposed, lane-dense)
            pltpu.VMEM((G, inner), jnp.float32),   # slice tokens (hydra layout)
            pltpu.VMEM((G, Di), jnp.float32),      # per-head SSD outputs
            pltpu.VMEM((N, inner), jnp.float32),   # desliced tokens before to_out
        ],
        compiler_params=pltpu.CompilerParams(
            dimension_semantics=("parallel",),     # >=2 steps -> both v7x TensorCores busy
            vmem_limit_bytes=32 * 1024 * 1024),
    )(x, *consts)


# ----------------------------- one-time parameter preprocessing -----------------------------
def prepare_params(params):
    H, dh, G = params['heads'], params['dim_head'], params['slice_num']
    inner = H * dh
    C = params['W_x'].shape[0]
    hp = params['hydra']
    Di, Ds, Hh, P = hp['d_inner'], hp['d_state'], hp['nheads'], hp['headdim']
    conv_dim = Di + 2 * Ds
    dim = params['W_out'].shape[1]

    inv_t = (1.0 / params['temperature'].reshape(H)).astype(jnp.float32)

    # compose in_project_x with in_project_slice and fold in 1/temperature:
    #   logits[b,h,n,g] = x[b,n] @ Wlog[:, h*G+g] + blog[h*G+g]
    Ws = params['W_slice']                                                  # (dh, G)
    Wlog = jnp.einsum('chd,dg->chg', params['W_x'].reshape(C, H, dh), Ws)   # (C, H, G)
    Wlog = (Wlog * inv_t[None, :, None]).reshape(C, H * G)
    blog = jnp.einsum('hd,dg->hg', params['b_x'].reshape(H, dh), Ws) + params['b_slice'][None, :]
    blog = (blog * inv_t[:, None]).reshape(H * G, 1)

    L = G
    ri = jnp.arange(L)[:, None]
    ci = jnp.arange(L)[None, :]
    Lm = (ri >= ci).astype(jnp.float32)
    Um = (ri <= ci).astype(jnp.float32)

    A = -jnp.exp(hp['A_log']).astype(jnp.float32)                           # (2*Hh,)
    two_h = 2 * Hh

    return {
        'H': H, 'dh': dh, 'G': G, 'inner': inner,
        'Di': Di, 'Ds': Ds, 'Hh': Hh, 'P': P, 'dim': dim,
        'W_fx': params['W_fx'], 'b_fx': params['b_fx'].reshape(1, inner),
        'WlogT': Wlog.T, 'blog': blog,
        'W_in': hp['W_in'],
        'WdtT': hp['W_in'][:, -two_h:].T,                                   # (2*Hh, inner)
        'conv_w': hp['conv_w'], 'conv_b': hp['conv_b'].reshape(1, conv_dim),
        'dtb_row': hp['dt_bias'].reshape(1, two_h), 'dtb_col': hp['dt_bias'].reshape(two_h, 1),
        'A_row': A.reshape(1, two_h), 'A_col': A.reshape(two_h, 1),
        'wfcdT': hp['W_fcD'].T,                                             # (Hh, Di)
        'D_row': hp['D'].reshape(1, Hh),
        'norm_w': hp['norm_w'].reshape(1, Di),
        'W_hout': hp['W_out'],
        'W_toout': params['W_out'], 'b_toout': params['b_out'].reshape(1, dim),
        'masks': jnp.stack([Lm, Um]),                                       # (2, L, L)
    }


# ----------------------------- deterministic parameter init -----------------------------
def init_params(key, dim, heads, dim_head, slice_num):
    inner = heads * dim_head
    headdim, d_state, d_conv = 128, 64, 3                # Hydra defaults / module args
    d_inner = inner                                      # expand = 1
    assert d_inner % headdim == 0
    nheads = d_inner // headdim
    d_in_proj = 2 * d_inner + 2 * d_state + 2 * nheads
    conv_dim = d_inner + 2 * d_state

    ks = jax.random.split(key, 8)

    def w(k, shape, scale=0.02):
        return (scale * jax.random.normal(k, shape)).astype(jnp.float32)

    return {
        'heads': heads, 'dim_head': dim_head, 'slice_num': slice_num,
        'temperature': 0.5 * jnp.ones((1, heads, 1, 1), jnp.float32),
        'W_x': w(ks[0], (dim, inner)), 'b_x': jnp.zeros((inner,), jnp.float32),
        'W_fx': w(ks[1], (dim, inner)), 'b_fx': jnp.zeros((inner,), jnp.float32),
        'W_slice': w(ks[2], (dim_head, slice_num), 0.1),
        'b_slice': jnp.zeros((slice_num,), jnp.float32),
        'W_out': w(ks[3], (inner, dim)), 'b_out': jnp.zeros((dim,), jnp.float32),
        'hydra': {
            'd_inner': d_inner, 'd_state': d_state, 'nheads': nheads, 'headdim': headdim,
            'W_in': w(ks[4], (inner, d_in_proj)),
            'conv_w': w(ks[5], (d_conv, conv_dim), 0.1),
            'conv_b': jnp.zeros((conv_dim,), jnp.float32),
            'dt_bias': jnp.linspace(-2.0, -1.0, 2 * nheads).astype(jnp.float32),
            'A_log': jnp.log(jnp.linspace(1.0, 4.0, 2 * nheads)).astype(jnp.float32),
            'D': jnp.ones((nheads,), jnp.float32),
            'W_fcD': w(ks[6], (d_inner, nheads)),
            'norm_w': jnp.ones((d_inner,), jnp.float32),
            'W_out': w(ks[7], (d_inner, inner)),
        },
    }


if __name__ == "__main__":
    key = jax.random.PRNGKey(0)
    dim, heads, dim_head, slice_num = 32, 2, 64, 16      # inner_dim = 128 (Hydra nheads = 1)
    B, N = 2, 64
    pk, xk = jax.random.split(key)
    params = init_params(pk, dim, heads, dim_head, slice_num)
    pp = prepare_params(params)                          # one-time weight preprocessing
    x = jax.random.normal(xk, (B, N, dim), jnp.float32)

    fwd = jax.jit(functools.partial(latent_ssm_forward, pp=pp))
    out = jax.block_until_ready(fwd(x))

    assert out.shape == (B, N, dim), out.shape
    assert bool(jnp.all(jnp.isfinite(out)))
    print("KERNEL_OK")
</pallas_src>

<mosaic_0001>
module attributes {stable_mosaic.version = 11 : i64} {
  func.func @_fused_kernel(%arg0: i32, %arg1: memref<1x64x32xf32, #tpu.memory_space<vmem>>, %arg2: memref<32x128xf32, #tpu.memory_space<vmem>>, %arg3: memref<1x128xf32, #tpu.memory_space<vmem>>, %arg4: memref<32x32xf32, #tpu.memory_space<vmem>>, %arg5: memref<32x1xf32, #tpu.memory_space<vmem>>, %arg6: memref<128x386xf32, #tpu.memory_space<vmem>>, %arg7: memref<2x128xf32, #tpu.memory_space<vmem>>, %arg8: memref<3x256xf32, #tpu.memory_space<vmem>>, %arg9: memref<1x256xf32, #tpu.memory_space<vmem>>, %arg10: memref<1x2xf32, #tpu.memory_space<vmem>>, %arg11: memref<2x1xf32, #tpu.memory_space<vmem>>, %arg12: memref<1x2xf32, #tpu.memory_space<vmem>>, %arg13: memref<2x1xf32, #tpu.memory_space<vmem>>, %arg14: memref<1x128xf32, #tpu.memory_space<vmem>>, %arg15: memref<1x1xf32, #tpu.memory_space<vmem>>, %arg16: memref<1x128xf32, #tpu.memory_space<vmem>>, %arg17: memref<128x128xf32, #tpu.memory_space<vmem>>, %arg18: memref<128x32xf32, #tpu.memory_space<vmem>>, %arg19: memref<1x32xf32, #tpu.memory_space<vmem>>, %arg20: memref<2x16x16xf32, #tpu.memory_space<vmem>>, %arg21: memref<1x64x32xf32, #tpu.memory_space<vmem>>, %arg22: memref<2x16x64xf32, #tpu.memory_space<vmem>>, %arg23: memref<16x128xf32, #tpu.memory_space<vmem>>, %arg24: memref<16x128xf32, #tpu.memory_space<vmem>>, %arg25: memref<64x128xf32, #tpu.memory_space<vmem>>) attributes {dimension_semantics = [#tpu.dimension_semantics<parallel>], iteration_bounds = array<i64: 2>, scalar_prefetch = 0 : i64, scratch_operands = 4 : i64, tpu.core_type = #tpu.core_type<tc>, window_params = [{transform_indices = @transform_0, window_bounds = array<i64: 1, 64, 32>}, {pipeline_mode = #tpu.pipeline_mode<synchronous>, transform_indices = @transform_1, window_bounds = array<i64: 32, 128>}, {pipeline_mode = #tpu.pipeline_mode<synchronous>, transform_indices = @transform_2, window_bounds = array<i64: 1, 128>}, {pipeline_mode = #tpu.pipeline_mode<synchronous>, transform_indices = @transform_3, window_bounds = array<i64: 32, 32>}, {pipeline_mode = #tpu.pipeline_mode<synchronous>, transform_indices = @transform_4, window_bounds = array<i64: 32, 1>}, {pipeline_mode = #tpu.pipeline_mode<synchronous>, transform_indices = @transform_5, window_bounds = array<i64: 128, 386>}, {pipeline_mode = #tpu.pipeline_mode<synchronous>, transform_indices = @transform_6, window_bounds = array<i64: 2, 128>}, {pipeline_mode = #tpu.pipeline_mode<synchronous>, transform_indices = @transform_7, window_bounds = array<i64: 3, 256>}, {pipeline_mode = #tpu.pipeline_mode<synchronous>, transform_indices = @transform_8, window_bounds = array<i64: 1, 256>}, {pipeline_mode = #tpu.pipeline_mode<synchronous>, transform_indices = @transform_9, window_bounds = array<i64: 1, 2>}, {pipeline_mode = #tpu.pipeline_mode<synchronous>, transform_indices = @transform_10, window_bounds = array<i64: 2, 1>}, {pipeline_mode = #tpu.pipeline_mode<synchronous>, transform_indices = @transform_11, window_bounds = array<i64: 1, 2>}, {pipeline_mode = #tpu.pipeline_mode<synchronous>, transform_indices = @transform_12, window_bounds = array<i64: 2, 1>}, {pipeline_mode = #tpu.pipeline_mode<synchronous>, transform_indices = @transform_13, window_bounds = array<i64: 1, 128>}, {pipeline_mode = #tpu.pipeline_mode<synchronous>, transform_indices = @transform_14, window_bounds = array<i64: 1, 1>}, {pipeline_mode = #tpu.pipeline_mode<synchronous>, transform_indices = @transform_15, window_bounds = array<i64: 1, 128>}, {pipeline_mode = #tpu.pipeline_mode<synchronous>, transform_indices = @transform_16, window_bounds = array<i64: 128, 128>}, {pipeline_mode = #tpu.pipeline_mode<synchronous>, transform_indices = @transform_17, window_bounds = array<i64: 128, 32>}, {pipeline_mode = #tpu.pipeline_mode<synchronous>, transform_indices = @transform_18, window_bounds = array<i64: 1, 32>}, {pipeline_mode = #tpu.pipeline_mode<synchronous>, transform_indices = @transform_19, window_bounds = array<i64: 2, 16, 16>}, {transform_indices = @transform_20, window_bounds = array<i64: 1, 64, 32>}]} {
    %c0 = arith.constant 0 : index
    %c0_0 = arith.constant 0 : index
    %c0_1 = arith.constant 0 : index
    %0 = vector.load %arg1[%c0, %c0_0, %c0_1] : memref<1x64x32xf32, #tpu.memory_space<vmem>>, vector<1x64x32xf32>
    %1 = vector.shape_cast %0 : vector<1x64x32xf32> to vector<64x32xf32>
    %c0_2 = arith.constant 0 : index
    %c0_3 = arith.constant 0 : index
    %2 = vector.load %arg2[%c0_2, %c0_3] : memref<32x128xf32, #tpu.memory_space<vmem>>, vector<32x128xf32>
    %cst = arith.constant dense<0.000000e+00> : vector<64x128xf32>
    %3 = tpu.matmul %1, %2, %cst {dimension_numbers = #tpu.dot_dimension_numbers<[1], [0], [0], [1], [0, 0, 1, 1], [], []>} : vector<64x32xf32>, vector<32x128xf32>, vector<64x128xf32> -> vector<64x128xf32>
    %c0_4 = arith.constant 0 : index
    %c0_5 = arith.constant 0 : index
    %4 = vector.load %arg3[%c0_4, %c0_5] : memref<1x128xf32, #tpu.memory_space<vmem>>, vector<1x128xf32>
    %5 = vector.broadcast %4 : vector<1x128xf32> to vector<64x128xf32>
    %6 = arith.addf %3, %5 : vector<64x128xf32>
    %c0_6 = arith.constant 0 : index
    %c0_7 = arith.constant 0 : index
    %7 = vector.load %arg4[%c0_6, %c0_7] : memref<32x32xf32, #tpu.memory_space<vmem>>, vector<32x32xf32>
    %cst_8 = arith.constant dense<0.000000e+00> : vector<32x64xf32>
    %8 = tpu.matmul %7, %1, %cst_8 {dimension_numbers = #tpu.dot_dimension_numbers<[1], [1], [0], [0], [0, 0, 1, 0], [], []>} : vector<32x32xf32>, vector<64x32xf32>, vector<32x64xf32> -> vector<32x64xf32>
    %c0_9 = arith.constant 0 : index
    %c0_10 = arith.constant 0 : index
    %9 = vector.load %arg5[%c0_9, %c0_10] : memref<32x1xf32, #tpu.memory_space<vmem>>, vector<32x1xf32>
    %10 = vector.broadcast %9 : vector<32x1xf32> to vector<32x64xf32>
    %11 = arith.addf %8, %10 : vector<32x64xf32>
    %12 = vector.extract_strided_slice %11 {offsets = [0, 0], sizes = [16, 64], strides = [1, 1]} : vector<32x64xf32> to vector<16x64xf32>
    %cst_11 = arith.constant dense<0xFF800000> : vector<64xf32>
    %13 = vector.multi_reduction <maximumf>, %12, %cst_11 [0] : vector<16x64xf32> to vector<64xf32>
    %14 = vector.shape_cast %13 : vector<64xf32> to vector<1x64xf32>
    %15 = vector.broadcast %14 : vector<1x64xf32> to vector<16x64xf32>
    %16 = arith.subf %12, %15 : vector<16x64xf32>
    %17 = math.exp %16 : vector<16x64xf32>
    %cst_12 = arith.constant dense<0.000000e+00> : vector<64xf32>
    %18 = vector.multi_reduction <add>, %17, %cst_12 [0] : vector<16x64xf32> to vector<64xf32>
    %19 = vector.shape_cast %18 : vector<64xf32> to vector<1x64xf32>
    %20 = vector.broadcast %19 : vector<1x64xf32> to vector<16x64xf32>
    %21 = arith.divf %17, %20 : vector<16x64xf32>
    %c0_13 = arith.constant 0 : index
    %c0_14 = arith.constant 0 : index
    %c0_15 = arith.constant 0 : index
    %22 = vector.load %arg22[%c0_13, %c0_14, %c0_15] : memref<2x16x64xf32, #tpu.memory_space<vmem>>, vector<1x16x64xf32>
    %23 = vector.shape_cast %22 : vector<1x16x64xf32> to vector<16x64xf32>
    %24 = vector.shape_cast %21 : vector<16x64xf32> to vector<1x16x64xf32>
    tpu.vector_store %arg22[%c0_13, %c0_14, %c0_15], %24 {strides = array<i32>} : memref<2x16x64xf32, #tpu.memory_space<vmem>>, vector<1x16x64xf32>,
    %cst_16 = arith.constant dense<0.000000e+00> : vector<16xf32>
    %25 = vector.multi_reduction <add>, %21, %cst_16 [1] : vector<16x64xf32> to vector<16xf32>
    %26 = vector.shape_cast %25 : vector<16xf32> to vector<16x1xf32>
    %27 = vector.extract_strided_slice %6 {offsets = [0, 0], sizes = [64, 64], strides = [1, 1]} : vector<64x128xf32> to vector<64x64xf32>
    %cst_17 = arith.constant dense<0.000000e+00> : vector<16x64xf32>
    %28 = tpu.matmul %21, %27, %cst_17 {dimension_numbers = #tpu.dot_dimension_numbers<[1], [0], [0], [1], [0, 0, 1, 1], [], []>} : vector<16x64xf32>, vector<64x64xf32>, vector<16x64xf32> -> vector<16x64xf32>
    %cst_18 = arith.constant 9.99999974E-6 : f32
    %29 = vector.broadcast %cst_18 : f32 to vector<16x1xf32>
    %30 = arith.addf %26, %29 : vector<16x1xf32>
    %31 = vector.broadcast %30 : vector<16x1xf32> to vector<16x64xf32>
    %32 = arith.divf %28, %31 : vector<16x64xf32>
    %c0_19 = arith.constant 0 : index
    %c0_20 = arith.constant 0 : index
    %33 = vector.load %arg23[%c0_19, %c0_20] : memref<16x128xf32, #tpu.memory_space<vmem>>, vector<16x64xf32>
    tpu.vector_store %arg23[%c0_19, %c0_20], %32 {strides = array<i32>} : memref<16x128xf32, #tpu.memory_space<vmem>>, vector<16x64xf32>,
    %34 = vector.extract_strided_slice %11 {offsets = [16, 0], sizes = [16, 64], strides = [1, 1]} : vector<32x64xf32> to vector<16x64xf32>
    %cst_21 = arith.constant dense<0xFF800000> : vector<64xf32>
    %35 = vector.multi_reduction <maximumf>, %34, %cst_21 [0] : vector<16x64xf32> to vector<64xf32>
    %36 = vector.shape_cast %35 : vector<64xf32> to vector<1x64xf32>
    %37 = vector.broadcast %36 : vector<1x64xf32> to vector<16x64xf32>
    %38 = arith.subf %34, %37 : vector<16x64xf32>
    %39 = math.exp %38 : vector<16x64xf32>
    %cst_22 = arith.constant dense<0.000000e+00> : vector<64xf32>
    %40 = vector.multi_reduction <add>, %39, %cst_22 [0] : vector<16x64xf32> to vector<64xf32>
    %41 = vector.shape_cast %40 : vector<64xf32> to vector<1x64xf32>
    %42 = vector.broadcast %41 : vector<1x64xf32> to vector<16x64xf32>
    %43 = arith.divf %39, %42 : vector<16x64xf32>
    %c1 = arith.constant 1 : index
    %c0_23 = arith.constant 0 : index
    %c0_24 = arith.constant 0 : index
    %44 = vector.load %arg22[%c1, %c0_23, %c0_24] : memref<2x16x64xf32, #tpu.memory_space<vmem>>, vector<1x16x64xf32>
    %45 = vector.shape_cast %44 : vector<1x16x64xf32> to vector<16x64xf32>
    %46 = vector.shape_cast %43 : vector<16x64xf32> to vector<1x16x64xf32>
    tpu.vector_store %arg22[%c1, %c0_23, %c0_24], %46 {strides = array<i32>} : memref<2x16x64xf32, #tpu.memory_space<vmem>>, vector<1x16x64xf32>,
    %cst_25 = arith.constant dense<0.000000e+00> : vector<16xf32>
    %47 = vector.multi_reduction <add>, %43, %cst_25 [1] : vector<16x64xf32> to vector<16xf32>
    %48 = vector.shape_cast %47 : vector<16xf32> to vector<16x1xf32>
    %49 = vector.extract_strided_slice %6 {offsets = [0, 64], sizes = [64, 64], strides = [1, 1]} : vector<64x128xf32> to vector<64x64xf32>
    %cst_26 = arith.constant dense<0.000000e+00> : vector<16x64xf32>
    %50 = tpu.matmul %43, %49, %cst_26 {dimension_numbers = #tpu.dot_dimension_numbers<[1], [0], [0], [1], [0, 0, 1, 1], [], []>} : vector<16x64xf32>, vector<64x64xf32>, vector<16x64xf32> -> vector<16x64xf32>
    %cst_27 = arith.constant 9.99999974E-6 : f32
    %51 = vector.broadcast %cst_27 : f32 to vector<16x1xf32>
    %52 = arith.addf %48, %51 : vector<16x1xf32>
    %53 = vector.broadcast %52 : vector<16x1xf32> to vector<16x64xf32>
    %54 = arith.divf %50, %53 : vector<16x64xf32>
    %c0_28 = arith.constant 0 : index
    %c64 = arith.constant 64 : index
    %55 = vector.load %arg23[%c0_28, %c64] : memref<16x128xf32, #tpu.memory_space<vmem>>, vector<16x64xf32>
    tpu.vector_store %arg23[%c0_28, %c64], %54 {strides = array<i32>} : memref<16x128xf32, #tpu.memory_space<vmem>>, vector<16x64xf32>,
    %c0_29 = arith.constant 0 : index
    %c0_30 = arith.constant 0 : index
    %56 = vector.load %arg23[%c0_29, %c0_30] : memref<16x128xf32, #tpu.memory_space<vmem>>, vector<16x128xf32>
    %57 = tpu.iota {dimensions = array<i32: 0>} : vector<16x1xi32>
    %c0_i32 = arith.constant 0 : i32
    %58 = vector.broadcast %c0_i32 : i32 to vector<16x1xi32>
    %59 = arith.cmpi sgt, %57, %58 : vector<16x1xi32>
    %60 = arith.extui %59 : vector<16x1xi1> to vector<16x1xi32>
    %61 = arith.sitofp %60 : vector<16x1xi32> to vector<16x1xf32>
    %c15_i32 = arith.constant 15 : i32
    %62 = vector.broadcast %c15_i32 : i32 to vector<16x1xi32>
    %63 = arith.cmpi slt, %57, %62 : vector<16x1xi32>
    %64 = arith.extui %63 : vector<16x1xi1> to vector<16x1xi32>
    %65 = arith.sitofp %64 : vector<16x1xi32> to vector<16x1xf32>
    %c0_31 = arith.constant 0 : index
    %c0_32 = arith.constant 0 : index
    %c0_33 = arith.constant 0 : index
    %66 = vector.load %arg20[%c0_31, %c0_32, %c0_33] : memref<2x16x16xf32, #tpu.memory_space<vmem>>, vector<1x16x16xf32>
    %67 = vector.shape_cast %66 : vector<1x16x16xf32> to vector<16x16xf32>
    %c1_34 = arith.constant 1 : index
    %c0_35 = arith.constant 0 : index
    %c0_36 = arith.constant 0 : index
    %68 = vector.load %arg20[%c1_34, %c0_35, %c0_36] : memref<2x16x16xf32, #tpu.memory_space<vmem>>, vector<1x16x16xf32>
    %69 = vector.shape_cast %68 : vector<1x16x16xf32> to vector<16x16xf32>
    %c0_37 = arith.constant 0 : index
    %c0_38 = arith.constant 0 : index
    %70 = vector.load %arg6[%c0_37, %c0_38] : memref<128x386xf32, #tpu.memory_space<vmem>>, vector<128x386xf32>
    %cst_39 = arith.constant dense<0.000000e+00> : vector<16x386xf32>
    %71 = tpu.matmul %56, %70, %cst_39 {dimension_numbers = #tpu.dot_dimension_numbers<[1], [0], [0], [1], [0, 0, 1, 1], [], []>} : vector<16x128xf32>, vector<128x386xf32>, vector<16x386xf32> -> vector<16x386xf32>
    %72 = vector.extract_strided_slice %71 {offsets = [0, 0], sizes = [16, 128], strides = [1, 1]} : vector<16x386xf32> to vector<16x128xf32>
    %73 = vector.extract_strided_slice %71 {offsets = [0, 128], sizes = [16, 256], strides = [1, 1]} : vector<16x386xf32> to vector<16x256xf32>
    %74 = vector.extract_strided_slice %71 {offsets = [0, 384], sizes = [16, 2], strides = [1, 1]} : vector<16x386xf32> to vector<16x2xf32>
    %c0_40 = arith.constant 0 : index
    %c0_41 = arith.constant 0 : index
    %75 = vector.load %arg8[%c0_40, %c0_41] : memref<3x256xf32, #tpu.memory_space<vmem>>, vector<3x256xf32>
    %c1_i32 = arith.constant 1 : i32
    %76 = tpu.dynamic_rotate %73 by %c1_i32 dim 0 : vector<16x256xf32>, i32 -> vector<16x256xf32>
    %77 = vector.broadcast %61 : vector<16x1xf32> to vector<16x256xf32>
    %78 = arith.mulf %76, %77 : vector<16x256xf32>
    %c15_i32_42 = arith.constant 15 : i32
    %79 = tpu.dynamic_rotate %73 by %c15_i32_42 dim 0 : vector<16x256xf32>, i32 -> vector<16x256xf32>
    %80 = vector.broadcast %65 : vector<16x1xf32> to vector<16x256xf32>
    %81 = arith.mulf %79, %80 : vector<16x256xf32>
    %82 = vector.extract_strided_slice %75 {offsets = [0, 0], sizes = [1, 256], strides = [1, 1]} : vector<3x256xf32> to vector<1x256xf32>
    %83 = vector.broadcast %82 : vector<1x256xf32> to vector<16x256xf32>
    %84 = arith.mulf %78, %83 : vector<16x256xf32>
    %85 = vector.extract_strided_slice %75 {offsets = [1, 0], sizes = [1, 256], strides = [1, 1]} : vector<3x256xf32> to vector<1x256xf32>
    %86 = vector.broadcast %85 : vector<1x256xf32> to vector<16x256xf32>
    %87 = arith.mulf %73, %86 : vector<16x256xf32>
    %88 = arith.addf %84, %87 : vector<16x256xf32>
    %89 = vector.extract_strided_slice %75 {offsets = [2, 0], sizes = [1, 256], strides = [1, 1]} : vector<3x256xf32> to vector<1x256xf32>
    %90 = vector.broadcast %89 : vector<1x256xf32> to vector<16x256xf32>
    %91 = arith.mulf %81, %90 : vector<16x256xf32>
    %92 = arith.addf %88, %91 : vector<16x256xf32>
    %c0_43 = arith.constant 0 : index
    %c0_44 = arith.constant 0 : index
    %93 = vector.load %arg9[%c0_43, %c0_44] : memref<1x256xf32, #tpu.memory_space<vmem>>, vector<1x256xf32>
    %94 = vector.broadcast %93 : vector<1x256xf32> to vector<16x256xf32>
    %95 = arith.addf %92, %94 : vector<16x256xf32>
    %96 = arith.negf %95 : vector<16x256xf32>
    %97 = math.exp %96 : vector<16x256xf32>
    %cst_45 = arith.constant 1.000000e+00 : f32
    %98 = vector.broadcast %cst_45 : f32 to vector<16x256xf32>
    %99 = arith.addf %98, %97 : vector<16x256xf32>
    %100 = arith.divf %98, %99 : vector<16x256xf32>
    %101 = arith.mulf %95, %100 : vector<16x256xf32>
    %102 = vector.extract_strided_slice %101 {offsets = [0, 0], sizes = [16, 128], strides = [1, 1]} : vector<16x256xf32> to vector<16x128xf32>
    %103 = vector.extract_strided_slice %101 {offsets = [0, 128], sizes = [16, 64], strides = [1, 1]} : vector<16x256xf32> to vector<16x64xf32>
    %104 = vector.extract_strided_slice %101 {offsets = [0, 192], sizes = [16, 64], strides = [1, 1]} : vector<16x256xf32> to vector<16x64xf32>
    %cst_46 = arith.constant dense<0.000000e+00> : vector<16x16xf32>
    %105 = tpu.matmul %104, %103, %cst_46 {dimension_numbers = #tpu.dot_dimension_numbers<[1], [1], [0], [0], [0, 0, 1, 0], [], []>} : vector<16x64xf32>, vector<16x64xf32>, vector<16x16xf32> -> vector<16x16xf32>
    %c0_47 = arith.constant 0 : index
    %c0_48 = arith.constant 0 : index
    %106 = vector.load %arg14[%c0_47, %c0_48] : memref<1x128xf32, #tpu.memory_space<vmem>>, vector<1x128xf32>
    %107 = vector.broadcast %106 : vector<1x128xf32> to vector<16x128xf32>
    %108 = arith.mulf %102, %107 : vector<16x128xf32>
    %cst_49 = arith.constant dense<0.000000e+00> : vector<16xf32>
    %109 = vector.multi_reduction <add>, %108, %cst_49 [1] : vector<16x128xf32> to vector<16xf32>
    %110 = vector.shape_cast %109 : vector<16xf32> to vector<16x1xf32>
    %c0_50 = arith.constant 0 : index
    %c0_51 = arith.constant 0 : index
    %111 = vector.load %arg15[%c0_50, %c0_51] : memref<1x1xf32, #tpu.memory_space<vmem>>, vector<1x1xf32>
    %112 = vector.broadcast %111 : vector<1x1xf32> to vector<16x1xf32>
    %113 = arith.addf %110, %112 : vector<16x1xf32>
    %c0_52 = arith.constant 0 : index
    %c0_53 = arith.constant 0 : index
    %114 = vector.load %arg10[%c0_52, %c0_53] : memref<1x2xf32, #tpu.memory_space<vmem>>, vector<1x2xf32>
    %115 = vector.broadcast %114 : vector<1x2xf32> to vector<16x2xf32>
    %116 = arith.addf %74, %115 : vector<16x2xf32>
    %cst_54 = arith.constant 0.000000e+00 : f32
    %117 = vector.broadcast %cst_54 : f32 to vector<16x2xf32>
    %118 = arith.maximumf %116, %117 : vector<16x2xf32>
    %119 = math.absf %116 : vector<16x2xf32>
    %cst_55 = arith.constant 0.000000e+00 : f32
    %120 = vector.broadcast %cst_55 : f32 to vector<16x2xf32>
    %121 = arith.subf %120, %119 : vector<16x2xf32>
    %122 = math.exp %121 : vector<16x2xf32>
    %cst_56 = arith.constant 1.000000e+00 : f32
    %123 = vector.broadcast %cst_56 : f32 to vector<16x2xf32>
    %124 = arith.addf %123, %122 : vector<16x2xf32>
    %125 = math.log %124 : vector<16x2xf32>
    %126 = arith.addf %118, %125 : vector<16x2xf32>
    %c0_57 = arith.constant 0 : index
    %c0_58 = arith.constant 0 : index
    %127 = vector.load %arg12[%c0_57, %c0_58] : memref<1x2xf32, #tpu.memory_space<vmem>>, vector<1x2xf32>
    %128 = vector.broadcast %127 : vector<1x2xf32> to vector<16x2xf32>
    %129 = arith.mulf %126, %128 : vector<16x2xf32>
    %cst_59 = arith.constant dense<0.000000e+00> : vector<16x2xf32>
    %130 = tpu.matmul %67, %129, %cst_59 {dimension_numbers = #tpu.dot_dimension_numbers<[1], [0], [0], [1], [0, 0, 1, 1], [], []>} : vector<16x16xf32>, vector<16x2xf32>, vector<16x2xf32> -> vector<16x2xf32>
    %cst_60 = arith.constant dense<0.000000e+00> : vector<16x2xf32>
    %131 = tpu.matmul %69, %129, %cst_60 {dimension_numbers = #tpu.dot_dimension_numbers<[1], [0], [0], [1], [0, 0, 1, 1], [], []>} : vector<16x16xf32>, vector<16x2xf32>, vector<16x2xf32> -> vector<16x2xf32>
    %c0_61 = arith.constant 0 : index
    %c0_62 = arith.constant 0 : index
    %132 = vector.load %arg7[%c0_61, %c0_62] : memref<2x128xf32, #tpu.memory_space<vmem>>, vector<2x128xf32>
    %cst_63 = arith.constant dense<0.000000e+00> : vector<2x16xf32>
    %133 = tpu.matmul %132, %56, %cst_63 {dimension_numbers = #tpu.dot_dimension_numbers<[1], [1], [0], [0], [0, 0, 1, 0], [], []>} : vector<2x128xf32>, vector<16x128xf32>, vector<2x16xf32> -> vector<2x16xf32>
    %c0_64 = arith.constant 0 : index
    %c0_65 = arith.constant 0 : index
    %134 = vector.load %arg11[%c0_64, %c0_65] : memref<2x1xf32, #tpu.memory_space<vmem>>, vector<2x1xf32>
    %135 = vector.broadcast %134 : vector<2x1xf32> to vector<2x16xf32>
    %136 = arith.addf %133, %135 : vector<2x16xf32>
    %cst_66 = arith.constant 0.000000e+00 : f32
    %137 = vector.broadcast %cst_66 : f32 to vector<2x16xf32>
    %138 = arith.maximumf %136, %137 : vector<2x16xf32>
    %139 = math.absf %136 : vector<2x16xf32>
    %cst_67 = arith.constant 0.000000e+00 : f32
    %140 = vector.broadcast %cst_67 : f32 to vector<2x16xf32>
    %141 = arith.subf %140, %139 : vector<2x16xf32>
    %142 = math.exp %141 : vector<2x16xf32>
    %cst_68 = arith.constant 1.000000e+00 : f32
    %143 = vector.broadcast %cst_68 : f32 to vector<2x16xf32>
    %144 = arith.addf %143, %142 : vector<2x16xf32>
    %145 = math.log %144 : vector<2x16xf32>
    %146 = arith.addf %138, %145 : vector<2x16xf32>
    %c0_69 = arith.constant 0 : index
    %c0_70 = arith.constant 0 : index
    %147 = vector.load %arg13[%c0_69, %c0_70] : memref<2x1xf32, #tpu.memory_space<vmem>>, vector<2x1xf32>
    %148 = vector.broadcast %147 : vector<2x1xf32> to vector<2x16xf32>
    %149 = arith.mulf %146, %148 : vector<2x16xf32>
    %cst_71 = arith.constant dense<0.000000e+00> : vector<2x16xf32>
    %150 = tpu.matmul %149, %69, %cst_71 {dimension_numbers = #tpu.dot_dimension_numbers<[1], [0], [0], [1], [0, 0, 1, 1], [], []>} : vector<2x16xf32>, vector<16x16xf32>, vector<2x16xf32> -> vector<2x16xf32>
    %cst_72 = arith.constant dense<0.000000e+00> : vector<2x16xf32>
    %151 = tpu.matmul %149, %67, %cst_72 {dimension_numbers = #tpu.dot_dimension_numbers<[1], [0], [0], [1], [0, 0, 1, 1], [], []>} : vector<2x16xf32>, vector<16x16xf32>, vector<2x16xf32> -> vector<2x16xf32>
    %152 = vector.extract_strided_slice %130 {offsets = [0, 0], sizes = [16, 1], strides = [1, 1]} : vector<16x2xf32> to vector<16x1xf32>
    %153 = vector.extract_strided_slice %150 {offsets = [0, 0], sizes = [1, 16], strides = [1, 1]} : vector<2x16xf32> to vector<1x16xf32>
    %154 = vector.broadcast %152 : vector<16x1xf32> to vector<16x16xf32>
    %155 = vector.broadcast %153 : vector<1x16xf32> to vector<16x16xf32>
    %156 = arith.subf %154, %155 : vector<16x16xf32>
    %157 = vector.extract_strided_slice %131 {offsets = [0, 1], sizes = [16, 1], strides = [1, 1]} : vector<16x2xf32> to vector<16x1xf32>
    %158 = vector.extract_strided_slice %151 {offsets = [1, 0], sizes = [1, 16], strides = [1, 1]} : vector<2x16xf32> to vector<1x16xf32>
    %159 = vector.broadcast %157 : vector<16x1xf32> to vector<16x16xf32>
    %160 = vector.broadcast %158 : vector<1x16xf32> to vector<16x16xf32>
    %161 = arith.subf %159, %160 : vector<16x16xf32>
    %cst_73 = arith.constant 0.000000e+00 : f32
    %162 = vector.broadcast %cst_73 : f32 to vector<16x16xf32>
    %163 = arith.minimumf %156, %162 : vector<16x16xf32>
    %164 = math.exp %163 : vector<16x16xf32>
    %165 = arith.mulf %164, %67 : vector<16x16xf32>
    %cst_74 = arith.constant 0.000000e+00 : f32
    %166 = vector.broadcast %cst_74 : f32 to vector<16x16xf32>
    %167 = arith.minimumf %161, %166 : vector<16x16xf32>
    %168 = math.exp %167 : vector<16x16xf32>
    %169 = arith.mulf %168, %69 : vector<16x16xf32>
    %170 = arith.mulf %105, %165 : vector<16x16xf32>
    %171 = vector.extract_strided_slice %146 {offsets = [0, 0], sizes = [1, 16], strides = [1, 1]} : vector<2x16xf32> to vector<1x16xf32>
    %172 = vector.broadcast %171 : vector<1x16xf32> to vector<16x16xf32>
    %173 = arith.mulf %170, %172 : vector<16x16xf32>
    %174 = arith.mulf %105, %169 : vector<16x16xf32>
    %175 = vector.extract_strided_slice %146 {offsets = [1, 0], sizes = [1, 16], strides = [1, 1]} : vector<2x16xf32> to vector<1x16xf32>
    %176 = vector.broadcast %175 : vector<1x16xf32> to vector<16x16xf32>
    %177 = arith.mulf %174, %176 : vector<16x16xf32>
    %cst_75 = arith.constant dense<0.000000e+00> : vector<16x128xf32>
    %178 = tpu.matmul %173, %102, %cst_75 {dimension_numbers = #tpu.dot_dimension_numbers<[1], [0], [0], [1], [0, 0, 1, 1], [], []>} : vector<16x16xf32>, vector<16x128xf32>, vector<16x128xf32> -> vector<16x128xf32>
    %cst_76 = arith.constant dense<0.000000e+00> : vector<16x128xf32>
    %179 = tpu.matmul %177, %102, %cst_76 {dimension_numbers = #tpu.dot_dimension_numbers<[1], [0], [0], [1], [0, 0, 1, 1], [], []>} : vector<16x16xf32>, vector<16x128xf32>, vector<16x128xf32> -> vector<16x128xf32>
    %c1_i32_77 = arith.constant 1 : i32
    %180 = tpu.dynamic_rotate %178 by %c1_i32_77 dim 0 : vector<16x128xf32>, i32 -> vector<16x128xf32>
    %181 = vector.broadcast %61 : vector<16x1xf32> to vector<16x128xf32>
    %182 = arith.mulf %180, %181 : vector<16x128xf32>
    %c15_i32_78 = arith.constant 15 : i32
    %183 = tpu.dynamic_rotate %179 by %c15_i32_78 dim 0 : vector<16x128xf32>, i32 -> vector<16x128xf32>
    %184 = vector.broadcast %65 : vector<16x1xf32> to vector<16x128xf32>
    %185 = arith.mulf %183, %184 : vector<16x128xf32>
    %186 = arith.addf %182, %185 : vector<16x128xf32>
    %187 = vector.broadcast %113 : vector<16x1xf32> to vector<16x128xf32>
    %188 = arith.mulf %102, %187 : vector<16x128xf32>
    %189 = arith.addf %186, %188 : vector<16x128xf32>
    %c0_79 = arith.constant 0 : index
    %c0_80 = arith.constant 0 : index
    %190 = vector.load %arg24[%c0_79, %c0_80] : memref<16x128xf32, #tpu.memory_space<vmem>>, vector<16x128xf32>
    tpu.vector_store %arg24[%c0_79, %c0_80], %189 {strides = array<i32>} : memref<16x128xf32, #tpu.memory_space<vmem>>, vector<16x128xf32>,
    %c0_81 = arith.constant 0 : index
    %c0_82 = arith.constant 0 : index
    %191 = vector.load %arg24[%c0_81, %c0_82] : memref<16x128xf32, #tpu.memory_space<vmem>>, vector<16x128xf32>
    %192 = arith.negf %72 : vector<16x128xf32>
    %193 = math.exp %192 : vector<16x128xf32>
    %cst_83 = arith.constant 1.000000e+00 : f32
    %194 = vector.broadcast %cst_83 : f32 to vector<16x128xf32>
    %195 = arith.addf %194, %193 : vector<16x128xf32>
    %196 = arith.divf %194, %195 : vector<16x128xf32>
    %197 = arith.mulf %72, %196 : vector<16x128xf32>
    %198 = arith.mulf %191, %197 : vector<16x128xf32>
    %199 = arith.mulf %198, %198 : vector<16x128xf32>
    %cst_84 = arith.constant dense<0.000000e+00> : vector<16xf32>
    %200 = vector.multi_reduction <add>, %199, %cst_84 [1] : vector<16x128xf32> to vector<16xf32>
    %201 = vector.shape_cast %200 : vector<16xf32> to vector<16x1xf32>
    %cst_85 = arith.constant 1.280000e+02 : f32
    %202 = vector.broadcast %cst_85 : f32 to vector<16x1xf32>
    %203 = arith.divf %201, %202 : vector<16x1xf32>
    %cst_86 = arith.constant 9.99999974E-6 : f32
    %204 = vector.broadcast %cst_86 : f32 to vector<16x1xf32>
    %205 = arith.addf %203, %204 : vector<16x1xf32>
    %206 = math.rsqrt %205 : vector<16x1xf32>
    %207 = vector.broadcast %206 : vector<16x1xf32> to vector<16x128xf32>
    %208 = arith.mulf %198, %207 : vector<16x128xf32>
    %c0_87 = arith.constant 0 : index
    %c0_88 = arith.constant 0 : index
    %209 = vector.load %arg16[%c0_87, %c0_88] : memref<1x128xf32, #tpu.memory_space<vmem>>, vector<1x128xf32>
    %210 = vector.broadcast %209 : vector<1x128xf32> to vector<16x128xf32>
    %211 = arith.mulf %208, %210 : vector<16x128xf32>
    %c0_89 = arith.constant 0 : index
    %c0_90 = arith.constant 0 : index
    %212 = vector.load %arg17[%c0_89, %c0_90] : memref<128x128xf32, #tpu.memory_space<vmem>>, vector<128x128xf32>
    %cst_91 = arith.constant dense<0.000000e+00> : vector<16x128xf32>
    %213 = tpu.matmul %211, %212, %cst_91 {dimension_numbers = #tpu.dot_dimension_numbers<[1], [0], [0], [1], [0, 0, 1, 1], [], []>} : vector<16x128xf32>, vector<128x128xf32>, vector<16x128xf32> -> vector<16x128xf32>
    %c0_92 = arith.constant 0 : index
    %c0_93 = arith.constant 0 : index
    %c0_94 = arith.constant 0 : index
    %214 = vector.load %arg22[%c0_92, %c0_93, %c0_94] : memref<2x16x64xf32, #tpu.memory_space<vmem>>, vector<1x16x64xf32>
    %215 = vector.shape_cast %214 : vector<1x16x64xf32> to vector<16x64xf32>
    %216 = vector.extract_strided_slice %213 {offsets = [0, 0], sizes = [16, 64], strides = [1, 1]} : vector<16x128xf32> to vector<16x64xf32>
    %cst_95 = arith.constant dense<0.000000e+00> : vector<64x64xf32>
    %217 = tpu.matmul %215, %216, %cst_95 {dimension_numbers = #tpu.dot_dimension_numbers<[0], [0], [1], [1], [0, 1, 1, 1], [], []>} : vector<16x64xf32>, vector<16x64xf32>, vector<64x64xf32> -> vector<64x64xf32>
    %c0_96 = arith.constant 0 : index
    %c0_97 = arith.constant 0 : index
    %218 = vector.load %arg25[%c0_96, %c0_97] : memref<64x128xf32, #tpu.memory_space<vmem>>, vector<64x64xf32>
    tpu.vector_store %arg25[%c0_96, %c0_97], %217 {strides = array<i32>} : memref<64x128xf32, #tpu.memory_space<vmem>>, vector<64x64xf32>,
    %c1_98 = arith.constant 1 : index
    %c0_99 = arith.constant 0 : index
    %c0_100 = arith.constant 0 : index
    %219 = vector.load %arg22[%c1_98, %c0_99, %c0_100] : memref<2x16x64xf32, #tpu.memory_space<vmem>>, vector<1x16x64xf32>
    %220 = vector.shape_cast %219 : vector<1x16x64xf32> to vector<16x64xf32>
    %221 = vector.extract_strided_slice %213 {offsets = [0, 64], sizes = [16, 64], strides = [1, 1]} : vector<16x128xf32> to vector<16x64xf32>
    %cst_101 = arith.constant dense<0.000000e+00> : vector<64x64xf32>
    %222 = tpu.matmul %220, %221, %cst_101 {dimension_numbers = #tpu.dot_dimension_numbers<[0], [0], [1], [1], [0, 1, 1, 1], [], []>} : vector<16x64xf32>, vector<16x64xf32>, vector<64x64xf32> -> vector<64x64xf32>
    %c0_102 = arith.constant 0 : index
    %c64_103 = arith.constant 64 : index
    %223 = vector.load %arg25[%c0_102, %c64_103] : memref<64x128xf32, #tpu.memory_space<vmem>>, vector<64x64xf32>
    tpu.vector_store %arg25[%c0_102, %c64_103], %222 {strides = array<i32>} : memref<64x128xf32, #tpu.memory_space<vmem>>, vector<64x64xf32>,
    %c0_104 = arith.constant 0 : index
    %c0_105 = arith.constant 0 : index
    %224 = vector.load %arg25[%c0_104, %c0_105] : memref<64x128xf32, #tpu.memory_space<vmem>>, vector<64x128xf32>
    %c0_106 = arith.constant 0 : index
    %c0_107 = arith.constant 0 : index
    %225 = vector.load %arg18[%c0_106, %c0_107] : memref<128x32xf32, #tpu.memory_space<vmem>>, vector<128x32xf32>
    %cst_108 = arith.constant dense<0.000000e+00> : vector<64x32xf32>
    %226 = tpu.matmul %224, %225, %cst_108 {dimension_numbers = #tpu.dot_dimension_numbers<[1], [0], [0], [1], [0, 0, 1, 1], [], []>} : vector<64x128xf32>, vector<128x32xf32>, vector<64x32xf32> -> vector<64x32xf32>
    %c0_109 = arith.constant 0 : index
    %c0_110 = arith.constant 0 : index
    %227 = vector.load %arg19[%c0_109, %c0_110] : memref<1x32xf32, #tpu.memory_space<vmem>>, vector<1x32xf32>
    %228 = vector.broadcast %227 : vector<1x32xf32> to vector<64x32xf32>
    %229 = arith.addf %226, %228 : vector<64x32xf32>
    %c0_111 = arith.constant 0 : index
    %c0_112 = arith.constant 0 : index
    %c0_113 = arith.constant 0 : index
    %230 = vector.load %arg21[%c0_111, %c0_112, %c0_113] : memref<1x64x32xf32, #tpu.memory_space<vmem>>, vector<1x64x32xf32>
    %231 = vector.shape_cast %230 : vector<1x64x32xf32> to vector<64x32xf32>
    %232 = vector.shape_cast %229 : vector<64x32xf32> to vector<1x64x32xf32>
    tpu.vector_store %arg21[%c0_111, %c0_112, %c0_113], %232 {strides = array<i32>} : memref<1x64x32xf32, #tpu.memory_space<vmem>>, vector<1x64x32xf32>,
    return
  }
  func.func @transform_0(%arg0: i32) -> (i32, i32, i32) {
    %c0_i32 = arith.constant 0 : i32
    %c0_i32_0 = arith.constant 0 : i32
    %c0_i32_1 = arith.constant 0 : i32
    return %arg0, %c0_i32, %c0_i32_0 : i32, i32, i32
  }
  func.func @transform_1(%arg0: i32) -> (i32, i32) {
    %c0_i32 = arith.constant 0 : i32
    %c0_i32_0 = arith.constant 0 : i32
    %c0_i32_1 = arith.constant 0 : i32
    return %c0_i32, %c0_i32_0 : i32, i32
  }
  func.func @transform_2(%arg0: i32) -> (i32, i32) {
    %c0_i32 = arith.constant 0 : i32
    %c0_i32_0 = arith.constant 0 : i32
    %c0_i32_1 = arith.constant 0 : i32
    return %c0_i32, %c0_i32_0 : i32, i32
  }
  func.func @transform_3(%arg0: i32) -> (i32, i32) {
    %c0_i32 = arith.constant 0 : i32
    %c0_i32_0 = arith.constant 0 : i32
    %c0_i32_1 = arith.constant 0 : i32
    return %c0_i32, %c0_i32_0 : i32, i32
  }
  func.func @transform_4(%arg0: i32) -> (i32, i32) {
    %c0_i32 = arith.constant 0 : i32
    %c0_i32_0 = arith.constant 0 : i32
    %c0_i32_1 = arith.constant 0 : i32
    return %c0_i32, %c0_i32_0 : i32, i32
  }
  func.func @transform_5(%arg0: i32) -> (i32, i32) {
    %c0_i32 = arith.constant 0 : i32
    %c0_i32_0 = arith.constant 0 : i32
    %c0_i32_1 = arith.constant 0 : i32
    return %c0_i32, %c0_i32_0 : i32, i32
  }
  func.func @transform_6(%arg0: i32) -> (i32, i32) {
    %c0_i32 = arith.constant 0 : i32
    %c0_i32_0 = arith.constant 0 : i32
    %c0_i32_1 = arith.constant 0 : i32
    return %c0_i32, %c0_i32_0 : i32, i32
  }
  func.func @transform_7(%arg0: i32) -> (i32, i32) {
    %c0_i32 = arith.constant 0 : i32
    %c0_i32_0 = arith.constant 0 : i32
    %c0_i32_1 = arith.constant 0 : i32
    return %c0_i32, %c0_i32_0 : i32, i32
  }
  func.func @transform_8(%arg0: i32) -> (i32, i32) {
    %c0_i32 = arith.constant 0 : i32
    %c0_i32_0 = arith.constant 0 : i32
    %c0_i32_1 = arith.constant 0 : i32
    return %c0_i32, %c0_i32_0 : i32, i32
  }
  func.func @transform_9(%arg0: i32) -> (i32, i32) {
    %c0_i32 = arith.constant 0 : i32
    %c0_i32_0 = arith.constant 0 : i32
    %c0_i32_1 = arith.constant 0 : i32
    return %c0_i32, %c0_i32_0 : i32, i32
  }
  func.func @transform_10(%arg0: i32) -> (i32, i32) {
    %c0_i32 = arith.constant 0 : i32
    %c0_i32_0 = arith.constant 0 : i32
    %c0_i32_1 = arith.constant 0 : i32
    return %c0_i32, %c0_i32_0 : i32, i32
  }
  func.func @transform_11(%arg0: i32) -> (i32, i32) {
    %c0_i32 = arith.constant 0 : i32
    %c0_i32_0 = arith.constant 0 : i32
    %c0_i32_1 = arith.constant 0 : i32
    return %c0_i32, %c0_i32_0 : i32, i32
  }
  func.func @transform_12(%arg0: i32) -> (i32, i32) {
    %c0_i32 = arith.constant 0 : i32
    %c0_i32_0 = arith.constant 0 : i32
    %c0_i32_1 = arith.constant 0 : i32
    return %c0_i32, %c0_i32_0 : i32, i32
  }
  func.func @transform_13(%arg0: i32) -> (i32, i32) {
    %c0_i32 = arith.constant 0 : i32
    %c0_i32_0 = arith.constant 0 : i32
    %c0_i32_1 = arith.constant 0 : i32
    return %c0_i32, %c0_i32_0 : i32, i32
  }
  func.func @transform_14(%arg0: i32) -> (i32, i32) {
    %c0_i32 = arith.constant 0 : i32
    %c0_i32_0 = arith.constant 0 : i32
    %c0_i32_1 = arith.constant 0 : i32
    return %c0_i32, %c0_i32_0 : i32, i32
  }
  func.func @transform_15(%arg0: i32) -> (i32, i32) {
    %c0_i32 = arith.constant 0 : i32
    %c0_i32_0 = arith.constant 0 : i32
    %c0_i32_1 = arith.constant 0 : i32
    return %c0_i32, %c0_i32_0 : i32, i32
  }
  func.func @transform_16(%arg0: i32) -> (i32, i32) {
    %c0_i32 = arith.constant 0 : i32
    %c0_i32_0 = arith.constant 0 : i32
    %c0_i32_1 = arith.constant 0 : i32
    return %c0_i32, %c0_i32_0 : i32, i32
  }
  func.func @transform_17(%arg0: i32) -> (i32, i32) {
    %c0_i32 = arith.constant 0 : i32
    %c0_i32_0 = arith.constant 0 : i32
    %c0_i32_1 = arith.constant 0 : i32
    return %c0_i32, %c0_i32_0 : i32, i32
  }
  func.func @transform_18(%arg0: i32) -> (i32, i32) {
    %c0_i32 = arith.constant 0 : i32
    %c0_i32_0 = arith.constant 0 : i32
    %c0_i32_1 = arith.constant 0 : i32
    return %c0_i32, %c0_i32_0 : i32, i32
  }
  func.func @transform_19(%arg0: i32) -> (i32, i32, i32) {
    %c0_i32 = arith.constant 0 : i32
    %c0_i32_0 = arith.constant 0 : i32
    %c0_i32_1 = arith.constant 0 : i32
    %c0_i32_2 = arith.constant 0 : i32
    return %c0_i32, %c0_i32_0, %c0_i32_1 : i32, i32, i32
  }
  func.func @transform_20(%arg0: i32) -> (i32, i32, i32) {
    %c0_i32 = arith.constant 0 : i32
    %c0_i32_0 = arith.constant 0 : i32
    %c0_i32_1 = arith.constant 0 : i32
    return %arg0, %c0_i32, %c0_i32_0 : i32, i32, i32
  }
}

</mosaic_0001>

<bundles_post_ra>
// kernel: latent_ssm_forward.1
= control target key start
LH: loop header
LB: loop body
LE: loop exit
PB: predicated region body
PF: predicated region fallthrough
CT: control target
= control target key end

     0   :  { %s5021_s0 = inlined_call_operand.vmem [shape: f32[2,64,32], index: 0, kind: input, shape index: {}]   ;;  %s5022_s1 = inlined_call_operand.hbm [shape: f32[32,128], index: 1, kind: input, shape index: {}]   ;;  %s5023_s2 = inlined_call_operand.vmem [shape: f32[1,128], index: 2, kind: input, shape index: {}]   ;;  %s5024_s3 = inlined_call_operand.hbm [shape: f32[32,32], index: 3, kind: input, shape index: {}]   ;;  %s5025_s4 = inlined_call_operand.vmem [shape: f32[32,1], index: 4, kind: input, shape index: {}]   ;;  %s5026_s5 = inlined_call_operand.hbm [shape: f32[128,386], index: 5, kind: input, shape index: {}]   ;;  %s5027_s6 = inlined_call_operand.hbm [shape: f32[2,128], index: 6, kind: input, shape index: {}]   ;;  %s5028_s7 = inlined_call_operand.hbm [shape: f32[3,256], index: 7, kind: input, shape index: {}]   ;;  %s5029_s8 = inlined_call_operand.vmem [shape: f32[1,256], index: 8, kind: input, shape index: {}]   ;;  %s5030_s9 = inlined_call_operand.hbm [shape: f32[1,2], index: 9, kind: input, shape index: {}]   ;;  %s5031_s10 = inlined_call_operand.hbm [shape: f32[2,1], index: 10, kind: input, shape index: {}]   ;;  %s5032_s11 = inlined_call_operand.hbm [shape: f32[1,2], index: 11, kind: input, shape index: {}]   ;;  %s5033_s12 = inlined_call_operand.hbm [shape: f32[2,1], index: 12, kind: input, shape index: {}]   ;;  %s5034_s13 = inlined_call_operand.vmem [shape: f32[1,128], index: 13, kind: input, shape index: {}]   ;;  %s5035_s14 = inlined_call_operand.<no memory space> [shape: f32[1,1], index: 14, kind: input, shape index: {}]   ;;  %s5036_s15 = inlined_call_operand.vmem [shape: f32[1,128], index: 15, kind: input, shape index: {}]   ;;  %s5037_s16 = inlined_call_operand.vmem [shape: f32[128,128], index: 16, kind: input, shape index: {}]   ;;  %s5038_s17 = inlined_call_operand.vmem [shape: f32[128,32], index: 17, kind: input, shape index: {}]   ;;  %s5039_s18 = inlined_call_operand.vmem [shape: f32[1,32], index: 18, kind: input, shape index: {}]   ;;  %s5040_s19 = inlined_call_operand.hbm [shape: f32[2,16,16], index: 19, kind: input, shape index: {}]   ;;  %s5041_s20 = inlined_call_operand.vmem [shape: f32[2,64,32], index: 20, kind: output, shape index: {}]  }
   0x1   :  { %5047 = sst [smem:[#allocation30_spill]] %s5021_s0  ;;  %v25_v0 = vstv %s5035_s14 }
   0x2   :  { %5048 = sst [smem:[#allocation31_spill]] %s5022_s1  ;;  %26 = vst [vmem:[#allocation6] sm:$0x1] %v25_v0 }
   0x3   :  { %5049 = sst [smem:[#allocation32_spill]] %s5023_s2 }
   0x4   :  { %5050 = sst [smem:[#allocation33_spill]] %s5024_s3 }
   0x5   :  { %5051 = sst [smem:[#allocation34_spill]] %s5025_s4 }
   0x6   :  { %27 = vsyncpa [#allocation8], 0 }
   0x7   :  { %28 = vsyncpa [#allocation10], 0 }
   0x8   :  { %29 = vsyncpa [#allocation13], 0 }
   0x9   :  { %30 = vsyncpa [#allocation16], 0 }
   0xa   :  { %31 = vsyncpa [#allocation19], 0 }
   0xb   :  { %32 = vsyncpa [#allocation22], 0  ;;  %s4426_s23 = smov 0  }
   0xc LB: > { %5052 = sst [smem:[#allocation29_spill]] %s4297_s23  ;;  %s4432_s24 = sadd.s32 4294967295, %s4297_s23   ;;  %s4297_s23 = sphi %s4426_s23, %s38_s23  }
   0xd   : > { %p3333_p0 = scmp.ge.s32.totalorder %s4297_s23, 1  ;;  %p494_p1 = scmp.lt.s32.totalorder %s4297_s23, 3 }
   0xe   : > { %p5045_p2 = scmp.eq.s32.totalorder %s4432_s24, 0  ;;  %s4299_s2 = smov [#allocation9]  }
   0xf   : > { %p4437_p3 = pnand %p3333_p0, %p494_p1  ;;  %s522_s25 = sshll.u32 %s4299_s2, 4  ;;  %s523_s25 = int_to_ptr.vmem [resolvable:$true] %s522_s25 }
  0x10   : > { %s4300_s3 = smov [#allocation12]   ;;  %s4301_s28 = smov [#allocation15]  }
  0x11   : > { %s5053_s14 = scalar_select %p4437_p3, 1, 0 }
  0x12   : > { %p3855_p4 = pneg %p4437_p3  ;;  %s552_s26 = sshll.u32 %s4300_s3, 4  ;;  %s4443_s26 = int_to_ptr.vmem [resolvable:$true] %s552_s26 }
  0x13   : > { %s577_s4 = sshll.u32 %s4301_s28, 4  ;;  %s4302_s29 = smov [#allocation18]   ;;  %s4451_s4 = int_to_ptr.vmem [resolvable:$true] %s577_s4 }
  0x14   : > { %p4447_p5 = pnand %p5045_p2, %p3855_p4  ;;  %s4453_s30 = sshll.u32 %s4302_s29, 4  ;;  %s600_s30 = int_to_ptr.vmem [resolvable:$true] %s4453_s30 }
  0x15   : > { %s4018_s21 = scalar_lea.vmem %s523_s25, 512  ;;  %p4026_p10 = scmp.lt.s32.totalorder %s523_s25, %s523_s25 }
  0x16   : > { %p4457_p6 = pneg %p4447_p5  ;;  %p4019_p7 = scmp.ne.s32.totalorder %s523_s25, %s4018_s21 }
  0x17   : > { %p4027_p11 = scmp.lt.s32.totalorder %s4018_s21, %s4018_s21 }
  0x18   : > { %p4021_p8 = pnand %p4019_p7, %p4457_p6 }
  0x19   : > { %p4028_p12 = por %p4027_p11, %p4026_p10 }
  0x1a   : > { %p4022_p9 = pneg %p4021_p8 }
  0x1c   : > { %p4029_p13 = pnand %p4028_p12, %p4022_p9 }
  0x1e   : > { %4032 = shalt.err (!%p4029_p13)
}
  0x1f   : > { %s5044_s1 = smov 128   ;;  %s4304_s22 = smov 8  }
  0x20   : > { %s5056_s28 = sld [smem:[#allocation33_spill]]  ;;  %s4044_s29 = scalar_lea.vmem %s4443_s26, 32 }
  0x21   : > { %p4045_p0 = scmp.ne.s32.totalorder %s4443_s26, %s4044_s29  ;;  %p4052_p7 = scmp.lt.s32.totalorder %s4443_s26, %s4443_s26 }
  0x22   : > { %p4053_p8 = scmp.lt.s32.totalorder %s4044_s29, %s4044_s29 }
  0x23   : > { %p4047_p1 = pnand %p4045_p0, %p4457_p6 }
  0x24   : > { %p4054_p9 = por %p4053_p8, %p4052_p7 }
  0x25   : > { %p4048_p4 = pneg %p4047_p1 }
  0x26   : > { %3861 = dma.hbm_to_vmem [thread:$0]  (!%p4447_p5), %s5056_s28, 512, %s523_s25, [#allocation10], %s5044_s1, %s5044_s1, %s4304_s22  }
  0x27   : > { %p4055_p10 = pnand %p4054_p9, %p4048_p4 }
  0x29   : > { %4058 = shalt.err (!%p4055_p10)
}
  0x2a   : > { %3867 = dma.hbm_to_vmem [thread:$0]  (!%p4447_p5), %s5027_s6, 32, %s4443_s26, [#allocation13]  }
  0x2b   : > { %s4070_s25 = scalar_lea.vmem %s4451_s4, 16  ;;  %s4077_s2 = scalar_lea.vmem %s4451_s4, 32 }
  0x2c   : > { %p4071_p11 = scmp.ne.s32.totalorder %s4451_s4, %s4070_s25  ;;  %p4078_p0 = scmp.lt.s32.totalorder %s4451_s4, %s4451_s4 }
  0x2d   : > { %p4079_p1 = scmp.lt.s32.totalorder %s4077_s2, %s4070_s25 }
  0x2e   : > { %p4073_p12 = pnand %p4071_p11, %p4457_p6 }
  0x2f   : > { %p4080_p4 = por %p4079_p1, %p4078_p0 }
  0x30   : > { %p4074_p13 = pneg %p4073_p12 }
  0x32   : > { %p4081_p7 = pnand %p4080_p4, %p4074_p13 }
  0x34   : > { %4084 = shalt.err (!%p4081_p7)
}
  0x35   : > { %3873 = dma.hbm_to_vmem [thread:$0]  (!%p4447_p5), %s5030_s9, 16, %s4451_s4, [#allocation16]  }
  0x36   : > { %s4096_s26 = scalar_lea.vmem %s600_s30, 16  ;;  %s4103_s28 = scalar_lea.vmem %s600_s30, 32 }
  0x37   : > { %p4097_p8 = scmp.ne.s32.totalorder %s600_s30, %s4096_s26  ;;  %p4104_p11 = scmp.lt.s32.totalorder %s600_s30, %s600_s30 }
  0x38   : > { %p4105_p12 = scmp.lt.s32.totalorder %s4103_s28, %s4096_s26 }
  0x39   : > { %p4099_p9 = pnand %p4097_p8, %p4457_p6 }
  0x3a   : > { %p4106_p13 = por %p4105_p12, %p4104_p11 }
  0x3b   : > { %p4100_p10 = pneg %p4099_p9 }
  0x3d   : > { %p4107_p0 = pnand %p4106_p13, %p4100_p10 }
  0x3f   : > { %4110 = shalt.err (!%p4107_p0)
}
  0x40   : > { %3879 = dma.hbm_to_vmem [thread:$0]  (!%p4447_p5), %s5032_s11, 16, %s600_s30, [#allocation19]  }
  0x41   : > { %s4305_s4 = smov [#allocation7]   ;;  %s4306_s2 = smov [#allocation11]  }
  0x42   : > { %s506_s25 = sshll.u32 %s4305_s4, 4  ;;  %s538_s23 = sshll.u32 %s4306_s2, 4  ;;  %s507_s25 = int_to_ptr.vmem [resolvable:$true] %s506_s25  ;;  %s539_s23 = int_to_ptr.vmem [resolvable:$true] %s538_s23 }
  0x43   : > { %s4122_s3 = scalar_lea.vmem %s507_s25, 512  ;;  %p4130_p8 = scmp.lt.s32.totalorder %s507_s25, %s507_s25 }
  0x44   : > { %p4123_p1 = scmp.ne.s32.totalorder %s507_s25, %s4122_s3  ;;  %p4131_p9 = scmp.lt.s32.totalorder %s4122_s3, %s4122_s3 }
  0x46   : > { %p4125_p4 = pnand %p4123_p1, %p4457_p6  ;;  %p4132_p10 = por %p4131_p9, %p4130_p8 }
  0x48   : > { %p4126_p7 = pneg %p4125_p4 }
  0x4a   : > { %p4133_p11 = pnand %p4132_p10, %p4126_p7 }
  0x4c   : > { %4136 = shalt.err (!%p4133_p11)
}
  0x4d   : > { %s5057_s28 = sld [smem:[#allocation31_spill]]  ;;  %s4148_s29 = scalar_lea.vmem %s539_s23, 8192 }
  0x4e   : > { %p4149_p12 = scmp.ne.s32.totalorder %s539_s23, %s4148_s29  ;;  %p4156_p1 = scmp.lt.s32.totalorder %s539_s23, %s539_s23 }
  0x4f   : > { %p4157_p4 = scmp.lt.s32.totalorder %s4148_s29, %s4148_s29 }
  0x50   : > { %p4151_p13 = pnand %p4149_p12, %p4457_p6 }
  0x51   : > { %p4158_p7 = por %p4157_p4, %p4156_p1 }
  0x52   : > { %p4152_p0 = pneg %p4151_p13 }
  0x53   : > { %3858 = dma.hbm_to_vmem [thread:$0]  (!%p4447_p5), %s5057_s28, 512, %s507_s25, [#allocation8], %s5044_s1, %s5044_s1, %s4304_s22  }
  0x54   : > { %p4159_p8 = pnand %p4158_p7, %p4152_p0 }
  0x56   : > { %4162 = shalt.err (!%p4159_p8)
}
  0x57   : > { %s4307_s21 = smov 512   ;;  %s4308_s4 = smov 32  }
  0x58   : > { %3864 = dma.hbm_to_vmem [thread:$0]  (!%p4447_p5), %s5026_s5, 8192, %s539_s23, [#allocation10], %s4307_s21, %s4307_s21, %s4308_s4  }
  0x59   : > { %s4309_s25 = smov [#allocation14]   ;;  %s4310_s26 = smov [#allocation17]  }
  0x5a   : > { %s563_s30 = sshll.u32 %s4309_s25, 4  ;;  %s588_s28 = sshll.u32 %s4310_s26, 4  ;;  %s564_s30 = int_to_ptr.vmem [resolvable:$true] %s563_s30  ;;  %s589_s28 = int_to_ptr.vmem [resolvable:$true] %s588_s28 }
  0x5b   : > { %s4174_s1 = scalar_lea.vmem %s564_s30, 128  ;;  %p4182_p12 = scmp.lt.s32.totalorder %s564_s30, %s564_s30 }
  0x5c   : > { %p4175_p9 = scmp.ne.s32.totalorder %s564_s30, %s4174_s1  ;;  %p4183_p13 = scmp.lt.s32.totalorder %s4174_s1, %s4174_s1 }
  0x5e   : > { %p4177_p10 = pnand %p4175_p9, %p4457_p6  ;;  %p4184_p0 = por %p4183_p13, %p4182_p12 }
  0x60   : > { %p4178_p11 = pneg %p4177_p10 }
  0x62   : > { %p4185_p1 = pnand %p4184_p0, %p4178_p11 }
  0x64   : > { %4188 = shalt.err (!%p4185_p1)
}
  0x65   : > { %3870 = dma.hbm_to_vmem [thread:$0]  (!%p4447_p5), %s5028_s7, 128, %s564_s30, [#allocation13]  }
  0x66   : > { %s4200_s23 = scalar_lea.vmem %s589_s28, 32  ;;  %p4208_p9 = scmp.lt.s32.totalorder %s589_s28, %s589_s28 }
  0x67   : > { %p4201_p4 = scmp.ne.s32.totalorder %s589_s28, %s4200_s23  ;;  %p4209_p10 = scmp.lt.s32.totalorder %s4200_s23, %s4200_s23 }
  0x69   : > { %p4203_p7 = pnand %p4201_p4, %p4457_p6  ;;  %p4210_p2 = por %p4209_p10, %p4208_p9 }
  0x6b   : > { %p4204_p8 = pneg %p4203_p7 }
  0x6d   : > { %p4211_p3 = pnand %p4210_p2, %p4204_p8 }
  0x6f   : > { %4214 = shalt.err (!%p4211_p3)
}
  0x70   : > { %3876 = dma.hbm_to_vmem [thread:$0]  (!%p4447_p5), %s5031_s10, 32, %s589_s28, [#allocation16]  }
  0x71   : > { %s4311_s4 = smov [#allocation20]   ;;  %s4312_s25 = smov [#allocation21]  }
  0x72   : > { %s610_s3 = sshll.u32 %s4311_s4, 4  ;;  %s638_s30 = sshll.u32 %s4312_s25, 4  ;;  %s611_s3 = int_to_ptr.vmem [resolvable:$true] %s610_s3  ;;  %s639_s30 = int_to_ptr.vmem [resolvable:$true] %s638_s30 }
  0x73   : > { %s4226_s26 = scalar_lea.vmem %s611_s3, 32  ;;  %p4234_p0 = scmp.lt.s32.totalorder %s611_s3, %s611_s3 }
  0x74   : > { %p4227_p11 = scmp.ne.s32.totalorder %s611_s3, %s4226_s26  ;;  %p4235_p2 = scmp.lt.s32.totalorder %s4226_s26, %s4226_s26 }
  0x76   : > { %p4229_p12 = pnand %p4227_p11, %p4457_p6  ;;  %p4236_p3 = por %p4235_p2, %p4234_p0 }
  0x78   : > { %p4230_p13 = pneg %p4229_p12 }
  0x7a   : > { %p4237_p1 = pnand %p4236_p3, %p4230_p13 }
  0x7c   : > { %4240 = shalt.err (!%p4237_p1)
}
  0x7d   : > { %3882 = dma.hbm_to_vmem [thread:$0]  (!%p4447_p5), %s5033_s12, 32, %s611_s3, [#allocation19]  }
  0x7e   : > { %s4252_s28 = scalar_lea.vmem %s639_s30, 512  ;;  %p4260_p9 = scmp.lt.s32.totalorder %s639_s30, %s639_s30 }
  0x7f   : > { %p4253_p4 = scmp.ne.s32.totalorder %s639_s30, %s4252_s28  ;;  %p4261_p10 = scmp.lt.s32.totalorder %s4252_s28, %s4252_s28 }
  0x81   : > { %p4255_p7 = pnand %p4253_p4, %p4457_p6  ;;  %p4262_p11 = por %p4261_p10, %p4260_p9 }
  0x83   : > { %p4256_p8 = pneg %p4255_p7 }
  0x85   : > { %p4263_p12 = pnand %p4262_p11, %p4256_p8 }
  0x87   : > { %4266 = shalt.err (!%p4263_p12)
}
  0x88   : > { %s5058_s23 = smov 128   ;;  %p5059_p13 = scmp.ne.s32.totalorder %s5053_s14, 0 }
  0x89   : > { %3885 = dma.hbm_to_vmem [thread:$0]  (!%p4447_p5), %s5040_s19, 512, %s639_s30, [#allocation22], %s5058_s23, %s5058_s23, %s4304_s22  }
  0x8a   : > { %662 = sbr.rel (%p5059_p13) target bundleno = 2948 (0xb84), region = 100  ;;  %p5060_p6 = scmp.eq.s32.totalorder (!%p5059_p13), %s4432_s24, 0 }
  0x8f   : > { %4272 = dma.done.wait (%p5060_p6), [#allocation8], 512   ;;  %p5061_p0 = pmov %p5060_p6 }
  0x91   : > { %4274 = vsyncadd (%p5061_p0), [#allocation8], 4294966784  ;;  %p5062_p2 = pmov %p5061_p0 }
  0x92   : > { %p5063_p3 = pmov %p5061_p0 }
  0x93   : > { %4276 = dma.done.wait (%p5062_p2), [#allocation10], 8704  }
  0x94   : > { %4278 = vsyncadd (%p5063_p3), [#allocation10], 4294958592  ;;  %p5064_p1 = pmov %p5061_p0 }
  0x95   : > { %p5065_p5 = pmov %p5061_p0 }
  0x96   : > { %4280 = dma.done.wait (%p5064_p1), [#allocation13], 160  }
  0x97   : > { %4282 = vsyncadd (%p5065_p5), [#allocation13], 4294967136  ;;  %p5066_p4 = pmov %p5061_p0 }
  0x98   : > { %p5067_p7 = pmov %p5061_p0 }
  0x99   : > { %4284 = dma.done.wait (%p5066_p4), [#allocation16], 48  }
  0x9a   : > { %4286 = vsyncadd (%p5067_p7), [#allocation16], 4294967248  ;;  %p5068_p8 = pmov %p5061_p0 }
  0x9b   : > { %p5069_p9 = pmov %p5061_p0 }
  0x9c   : > { %4288 = dma.done.wait (%p5068_p8), [#allocation19], 48  }
  0x9d   : > { %4290 = vsyncadd (%p5069_p9), [#allocation19], 4294967248  ;;  %p5070_p10 = pmov %p5061_p0 }
  0x9e   : > { %p5071_p11 = pmov %p5061_p0 }
  0x9f   : > { %4292 = dma.done.wait (%p5070_p10), [#allocation22], 512  }
  0xa0   : > { %4294 = vsyncadd (%p5071_p11), [#allocation22], 4294966784  ;;  %p756_p12 = scmp.lt.s32.totalorder %s4432_s24, 1  ;;  %v4313_v1 = vmov 0   ;;  %s5072_s22 = sld [smem:[#allocation30_spill]]  ;;  %vm785_vm0 = vcmask 261120  }
  0xa1   : > { %3933 = vset.pattern.permute.xlu0 %v4313_v1  ;;  %3934 = vset.pattern.permute.xlu1 %v4313_v1  ;;  %v777_v2 = vld [vmem:[#allocation7 + $0x18] sm:$0xff]  ;;  %v776_v4 = vld [vmem:[#allocation7 + $0x10] sm:$0xff]  ;;  %v775_v6 = vld [vmem:[#allocation7 + $0x8] sm:$0xff]  ;;  %s5073_s30 = sld [smem:[#allocation34_spill]]  ;;  %vm1040_vm1 = vcmask 523264   ;;  %vm1328_vm2 = vcmask 1048064  }
  0xa2   : > { %s5077_s24 = smov (!%p756_p12, %s4432_s24), 1  ;;  %3568 = vmatprep.subr.mxu0 %v777_v2  ;;  %v774_v8 = vld [vmem:[#allocation7] sm:$0xff]  ;;  %v916_v19 = vld [vmem:[#allocation9 + $0x8] sm:$0xff]  ;;  %v917_v20 = vld [vmem:[#allocation9 + $0x10] sm:$0xff]  ;;  %s5074_s0 = sld [smem:[#allocation32_spill]]  ;;  %vm1864_vm7 = vcmask 130048  }
  0xa3   : > { %s3431_s14 = sshll.u32 %s5077_s24, 6  ;;  %3569 = vmatpush3.msra.mxu0 %v777_v2  ;;  %v915_v10 = vld [vmem:[#allocation9] sm:$0xff]  ;;  %v918_v21 = vld [vmem:[#allocation9 + $0x18] sm:$0xff]  ;;  %vm4316_vm8 = vmmov 0  }
  0xa4   : > { %3570 = vmatprep.subr.mxu0 %v776_v4  ;;  %3604 = vmatprep.mubr.msk.f32.mxu1 %vm785_vm0, %v915_v10  ;;  %s765_s3 = scalar_lea.vmem %s5041_s20, %s3431_s14 }
  0xa5   : > { %3571 = vmatpush3.msra.mxu0 %v776_v4 }
  0xa6   : > { %s4590_s4 = scalar_lea.vmem %s5072_s22, %s3431_s14  ;;  %3572 = vmatprep.subr.mxu0 %v775_v6  ;;  %s4314_s22 = smov 64  }
  0xa7   : > { %v773_v3 = vld [vmem:[%s4590_s4 + $0x38] sm:$0xff]  ;;  %v772_v5 = vld [vmem:[%s4590_s4 + $0x30] sm:$0xff]  ;;  %v766_v7 = vld [vmem:[%s4590_s4] sm:$0xff]  ;;  %3573 = vmatpush3.msra.mxu0 %v775_v6 }
  0xa8   : > { %3588 = vmatprep.subr.msk.mxu1 %vm785_vm0, %v773_v3  ;;  %3576 = vmatprep.mubr.msk.f32.mxu0 %vm785_vm0, %v766_v7  ;;  %v771_v9 = vld [vmem:[%s4590_s4 + $0x28] sm:$0xff]  ;;  %v921_v11 = vld [vmem:[%s5073_s30 + $0x10] sm:$0xff]  ;;  %v919_v13 = vld [vmem:[%s5073_s30] sm:$0xff] }
  0xa9   : > { %3589 = vmatpush3.xpose.msk.msra.mxu1 %vm785_vm0, %v773_v3  ;;  %v767_v12 = vld [vmem:[%s4590_s4 + $0x8] sm:$0xff]  ;;  %3574 = vmatprep.subr.mxu0 %v774_v8  ;;  %v768_v14 = vld [vmem:[%s4590_s4 + $0x10] sm:$0xff]  ;;  %v770_v15 = vld [vmem:[%s4590_s4 + $0x20] sm:$0xff] }
  0xaa   : > { %3590 = vmatprep.subr.msk.mxu1 %vm785_vm0, %v772_v5  ;;  %3575 = vmatpush3.msra.mxu0 %v774_v8  ;;  %v922_v16 = vld [vmem:[%s5073_s30 + $0x18] sm:$0xff]  ;;  %v920_v18 = vld [vmem:[%s5073_s30 + $0x8] sm:$0xff]  ;;  %v3360_v26 = vld [vmem:[%s5074_s0] ss:$0 sm:$0xff] }
  0xab   : > { %935 = vperm.xlu0 %3933, %v921_v11   ;;  %3577 = vmatmul.mubr.msk.f32.vlgmr.msra.gmra.mxu0 %vm785_vm0, %v767_v12  ;;  %v769_v17 = vld [vmem:[%s4590_s4 + $0x18] sm:$0xff] }
  0xac   : > { %925 = vperm.xlu1 %3934, %v919_v13   ;;  %3579 = vmatprep.mubr.msk.f32.mxu0 %vm785_vm0, %v768_v14 }
  0xad   : > { %3591 = vmatpush3.xpose.msk.msra.mxu1 %vm785_vm0, %v772_v5 }
  0xae   : > { %3592 = vmatprep.subr.msk.mxu1 %vm785_vm0, %v771_v9 }
  0xaf   : > { %940 = vperm.xlu0 %3933, %v922_v16   ;;  %3580 = vmatmul.mubr.msk.f32.gmra.mxu0 %vm785_vm0, %v769_v17 }
  0xb0   : > { %3582 = vmatprep.mubr.msk.f32.mxu0 %vm785_vm0, %v770_v15 }
  0xb1   : > { %3593 = vmatpush3.xpose.msk.msra.mxu1 %vm785_vm0, %v771_v9 }
  0xb2   : > { %3594 = vmatprep.subr.msk.mxu1 %vm785_vm0, %v770_v15 }
  0xb3   : > { %930 = vperm.xlu0 %3933, %v920_v18   ;;  %3583 = vmatmul.mubr.msk.f32.gmra.mxu0 %vm785_vm0, %v771_v9 }
  0xb4   : > { %3585 = vmatprep.mubr.msk.f32.mxu0 %vm785_vm0, %v772_v5 }
  0xb5   : > { %3595 = vmatpush3.xpose.msk.msra.mxu1 %vm785_vm0, %v770_v15 }
  0xb6   : > { %3596 = vmatprep.subr.msk.mxu1 %vm785_vm0, %v769_v17 }
  0xb7   : > { %3586 = vmatmul.mubr.msk.f32.gmra.mxu0 %vm785_vm0, %v773_v3 }
  0xb9   : > { %3597 = vmatpush3.xpose.msk.msra.mxu1 %vm785_vm0, %v769_v17 }
  0xba   : > { %3598 = vmatprep.subr.msk.mxu1 %vm785_vm0, %v768_v14 }
  0xbd   : > { %3599 = vmatpush3.xpose.msk.msra.mxu1 %vm785_vm0, %v768_v14 }
  0xbe   : > { %3600 = vmatprep.subr.msk.mxu1 %vm785_vm0, %v767_v12 }
  0xc1   : > { %3601 = vmatpush3.xpose.msk.msra.mxu1 %vm785_vm0, %v767_v12 }
  0xc2   : > { %3602 = vmatprep.subr.msk.mxu1 %vm785_vm0, %v766_v7 }
  0xc5   : > { %3603 = vmatpush3.xpose.msk.msra.mxu1 %vm785_vm0, %v766_v7 }
  0xc8   : > { %3605 = vmatmul.mubr.msk.f32.vlgmr.msra.gmra.mxu1 %vm785_vm0, %v916_v19 }
  0xc9   : > { %3607 = vmatprep.mubr.msk.f32.mxu1 %vm785_vm0, %v917_v20 }
  0xcc   : > { %3608 = vmatmul.mubr.msk.f32.gmra.mxu1 %vm785_vm0, %v918_v21 }
 0x126   : > { %v936_v30 = vpop.permute.xlu0 %935 }
 0x127   : > { %v926_v42 = vpop.permute.xlu1 %925 }
 0x12a   : > { %v941_v36 = vpop.permute.xlu0 %940 }
 0x12e   : > { %v931_v39 = vpop.permute.xlu0 %930 }
 0x16b   : > { %v3578_v22 = vpop.f32.mrf.mxu0 }
 0x16c   : > { %v882_v37 = vadd.f32 %v3578_v22, %v3360_v26 }
 0x16d   : > { %v876_v23 = vpop.f32.mrf.mxu0 }
 0x16e   : > { %v877_v47 = vadd.f32 %v3360_v26, %v876_v23 }
 0x16f   : > { %v3581_v24 = vpop.f32.mrf.mxu0 }
 0x170   : > { %v892_v32 = vadd.f32 %v3581_v24, %v3360_v26 }
 0x171   : > { %v886_v25 = vpop.f32.mrf.mxu0 }
 0x172   : > { %v887_v40 = vadd.f32 %v3360_v26, %v886_v25 }
 0x173   : > { %v3584_v27 = vpop.f32.mrf.mxu0 }
 0x174   : > { %v902_v28 = vadd.f32 %v3584_v27, %v3360_v26 }
 0x175   : > { %v896_v29 = vpop.f32.mrf.mxu0 }
 0x176   : > { %1219 = vrot.lane.b32.xlu0 %v902_v28, %s4314_s22  ;;  %v897_v38 = vadd.f32 %v3360_v26, %v896_v29 }
 0x177   : > { %v3587_v31 = vpop.f32.mrf.mxu0 }
 0x178   : > { %v912_v33 = vadd.f32 %v3587_v31, %v3360_v26 }
 0x179   : > { %v906_v34 = vpop.f32.mrf.mxu0 }
 0x17a   : > { %v907_v35 = vadd.f32 %v3360_v26, %v906_v34  ;;  %1215 = vrot.lane.b32.xlu0 %v892_v32, %s4314_s22  ;;  %1223 = vrot.lane.b32.xlu1 %v912_v33, %s4314_s22 }
 0x17b   : > { %3610 = vmatprep.subr.mxu1 %v912_v33 }
 0x17c   : > { %3611 = vmatpush3.msra.mxu1 %v912_v33 }
 0x17d   : > { %3612 = vmatprep.subr.mxu1 %v907_v35 }
 0x17e   : > { %3613 = vmatpush3.msra.mxu1 %v907_v35  ;;  %1211 = vrot.lane.b32.xlu0 %v882_v37, %s4314_s22 }
 0x17f   : > { %1221 = vrot.lane.b32.xlu1 %v907_v35, %s4314_s22  ;;  %3614 = vmatprep.subr.mxu1 %v902_v28 }
 0x180   : > { %3615 = vmatpush3.msra.mxu1 %v902_v28 }
 0x181   : > { %3616 = vmatprep.subr.mxu1 %v897_v38 }
 0x182   : > { %3617 = vmatpush3.msra.mxu1 %v897_v38 }
 0x183   : > { %1217 = vrot.lane.b32.xlu1 %v897_v38, %s4314_s22  ;;  %3618 = vmatprep.subr.mxu1 %v892_v32 }
 0x184   : > { %3619 = vmatpush3.msra.mxu1 %v892_v32 }
 0x185   : > { %3620 = vmatprep.subr.mxu1 %v887_v40 }
 0x186   : > { %3621 = vmatpush3.msra.mxu1 %v887_v40 }
 0x187   : > { %1213 = vrot.lane.b32.xlu1 %v887_v40, %s4314_s22  ;;  %3622 = vmatprep.subr.mxu1 %v882_v37 }
 0x188   : > { %v3606_v41 = vpop.f32.mrf.mxu1  ;;  %3623 = vmatpush3.msra.mxu1 %v882_v37 }
 0x189   : > { %v1027_v43 = vadd.f32 %v3606_v41, %v931_v39  ;;  %3624 = vmatprep.subr.mxu1 %v877_v47 }
 0x18a   : > { %v1021_v44 = vpop.f32.mrf.mxu1  ;;  %3625 = vmatpush3.msra.mxu1 %v877_v47 }
 0x18b   : > { %v1042_v45 = vsel %vm1040_vm1, %v1027_v43, -inf  ;;  %v1022_v46 = vadd.f32 %v1021_v44, %v926_v42  ;;  %1209 = vrot.lane.b32.xlu1 %v877_v47, %s4314_s22 }
 0x18c   : > { %v3609_v48 = vpop.f32.mrf.mxu1 }
 0x18d   : > { %v1041_v49 = vsel %vm1040_vm1, %v1022_v46, -inf  ;;  %v1037_v50 = vadd.f32 %v3609_v48, %v941_v36 }
 0x18e   : > { %v1043_v51 = vmax.f32 %v1041_v49, %v1042_v45  ;;  %v1031_v52 = vpop.f32.mrf.mxu1 }
 0x18f   : > { %v1166_v53 = vsel %vm1040_vm1, %v1037_v50, -inf  ;;  %v1032_v54 = vadd.f32 %v1031_v52, %v936_v30 }
 0x190   : > { %v1044_v55 = vrot.slane %v1043_v51, 4 }
 0x191   : > { %v1165_v56 = vsel %vm1040_vm1, %v1032_v54, -inf }
 0x192   : > { %v1045_v57 = vmax.f32 %v1043_v51, %v1044_v55  ;;  %v1167_v58 = vmax.f32 %v1165_v56, %v1166_v53  ;;  %v1416_v55 = vld [vmem:[#allocation11 + $0x1f8] sm:$0xff]  ;;  %v1413_v56 = vld [vmem:[#allocation11 + $0x1e0] sm:$0xff] }
 0x194   : > { %v1046_v59 = vrot.slane %v1045_v57, 2  ;;  %v1168_v60 = vrot.slane %v1167_v58, 4 }
 0x196   : > { %v1047_v61 = vmax.f32 %v1045_v57, %v1046_v59  ;;  %v1169_v62 = vmax.f32 %v1167_v58, %v1168_v60  ;;  %v1415_v57 = vld [vmem:[#allocation11 + $0x1f0] sm:$0xff]  ;;  %v1410_v58 = vld [vmem:[#allocation11 + $0x1c8] sm:$0xff]  ;;  %v1412_v59 = vld [vmem:[#allocation11 + $0x1d8] sm:$0xff] }
 0x197   : > { %v1409_v60 = vld [vmem:[#allocation11 + $0x1c0] sm:$0xff] }
 0x198   : > { %v1048_v63 = vrot.slane %v1047_v61, 1  ;;  %v1170_v0 = vrot.slane %v1169_v62, 2 }
 0x19a   : > { %v1049_v2 = vmax.f32 %v1047_v61, %v1048_v63  ;;  %v1171_v3 = vmax.f32 %v1169_v62, %v1170_v0  ;;  %v1411_v61 = vld [vmem:[#allocation11 + $0x1d0] sm:$0xff]  ;;  %v1406_v62 = vld [vmem:[#allocation11 + $0x1a8] sm:$0xff]  ;;  %v1408_v63 = vld [vmem:[#allocation11 + $0x1b8] sm:$0xff] }
 0x19b   : > { %v1405_v0 = vld [vmem:[#allocation11 + $0x1a0] sm:$0xff] }
 0x19c   : > { %v1050_v4 = vsub.f32 %v1022_v46, %v1049_v2  ;;  %v1051_v5 = vsub.f32 %v1027_v43, %v1049_v2  ;;  %v1172_v6 = vrot.slane %v1171_v3, 1  ;;  %v1407_v2 = vld [vmem:[#allocation11 + $0x1b0] sm:$0xff] }
 0x19e   : > { %v1052_v7 = vmul.f32 1.442695, %v1050_v4  ;;  %v1054_v8 = vmul.f32 1.442695, %v1051_v5  ;;  %v1173_v9 = vmax.f32 %v1171_v3, %v1172_v6  ;;  %v1402_v3 = vld [vmem:[#allocation11 + $0x188] sm:$0xff]  ;;  %v1404_v4 = vld [vmem:[#allocation11 + $0x198] sm:$0xff] }
 0x19f   : > { %v1401_v5 = vld [vmem:[#allocation11 + $0x180] sm:$0xff]  ;;  %v1403_v6 = vld [vmem:[#allocation11 + $0x190] sm:$0xff] }
 0x1a0   : > { %3939 = vpow2.f32 %v1052_v7  ;;  %v1174_v10 = vsub.f32 %v1032_v54, %v1173_v9  ;;  %v1175_v11 = vsub.f32 %v1037_v50, %v1173_v9  ;;  %v1414_v54 = vld [vmem:[#allocation11 + $0x1e8] sm:$0xff]  ;;  %v1397_v9 = vld [vmem:[#allocation11 + $0x160] sm:$0xff] }
 0x1a1   : > { %3941 = vpow2.f32 %v1054_v8  ;;  %1417 = vmatprep.subr.mxu1 %v1414_v54  ;;  %v1398_v7 = vld [vmem:[#allocation11 + $0x168] sm:$0xff]  ;;  %v1400_v8 = vld [vmem:[#allocation11 + $0x178] sm:$0xff] }
 0x1a2   : > { %v1176_v12 = vmul.f32 1.442695, %v1174_v10  ;;  %v1178_v13 = vmul.f32 1.442695, %v1175_v11  ;;  %v1399_v10 = vld [vmem:[#allocation11 + $0x170] sm:$0xff]  ;;  %v1394_v11 = vld [vmem:[#allocation11 + $0x148] sm:$0xff] }
 0x1a3   : > { %v1368_v54 = vld [vmem:[#allocation11 + $0x78] sm:$0xff] }
 0x1a4   : > { %3943 = vpow2.f32 %v1176_v12  ;;  %v1396_v12 = vld [vmem:[#allocation11 + $0x158] sm:$0xff] }
 0x1a5   : > { %3945 = vpow2.f32 %v1178_v13  ;;  %v1393_v13 = vld [vmem:[#allocation11 + $0x140] sm:$0xff] }
 0x1ad   : > { %v3940_v14 = vpop.eup %3939 }
 0x1ae   : > { %v3942_v15 = vpop.eup %3941  ;;  %v1056_v16 = vsel %vm1040_vm1, %v3940_v14, 0.0 }
 0x1af   : > { %v1057_v17 = vsel %vm1040_vm1, %v3942_v15, 0.0 }
 0x1b0   : > { %v1058_v18 = vadd.f32 %v1057_v17, %v1056_v16  ;;  %v1392_v16 = vld [vmem:[#allocation11 + $0x138] sm:$0xff]  ;;  %v1389_v17 = vld [vmem:[#allocation11 + $0x120] sm:$0xff] }
 0x1b1   : > { %v3944_v19 = vpop.eup %3943 }
 0x1b2   : > { %v3946_v20 = vpop.eup %3945  ;;  %v1059_v21 = vrot.slane %v1058_v18, 4  ;;  %v1180_v22 = vsel %vm1040_vm1, %v3944_v19, 0.0 }
 0x1b3   : > { %v1181_v23 = vsel %vm1040_vm1, %v3946_v20, 0.0 }
 0x1b4   : > { %v1060_v24 = vadd.f32 %v1059_v21, %v1058_v18  ;;  %v1182_v25 = vadd.f32 %v1181_v23, %v1180_v22  ;;  %v1391_v18 = vld [vmem:[#allocation11 + $0x130] sm:$0xff]  ;;  %v1385_v21 = vld [vmem:[#allocation11 + $0x100] sm:$0xff]  ;;  %v1382_v23 = vld [vmem:[#allocation11 + $0xe8] sm:$0xff] }
 0x1b5   : > { %v1387_v22 = vld [vmem:[#allocation11 + $0x110] sm:$0xff] }
 0x1b6   : > { %v1061_v26 = vrot.slane %v1060_v24, 2  ;;  %v1183_v27 = vrot.slane %v1182_v25, 4 }
 0x1b8   : > { %v1062_v28 = vadd.f32 %v1061_v26, %v1060_v24  ;;  %v1184_v29 = vadd.f32 %v1183_v27, %v1182_v25  ;;  %v1384_v24 = vld [vmem:[#allocation11 + $0xf8] sm:$0xff]  ;;  %v1381_v25 = vld [vmem:[#allocation11 + $0xe0] sm:$0xff]  ;;  %v1383_v26 = vld [vmem:[#allocation11 + $0xf0] sm:$0xff] }
 0x1b9   : > { %v1378_v27 = vld [vmem:[#allocation11 + $0xc8] sm:$0xff] }
 0x1ba   : > { %v1185_v30 = vrot.slane %v1184_v29, 2  ;;  %v1063_v31 = vrot.slane %v1062_v28, 1 }
 0x1bc   : > { %v1064_v32 = vadd.f32 %v1063_v31, %v1062_v28  ;;  %v1186_v33 = vadd.f32 %v1185_v30, %v1184_v29  ;;  %v1380_v28 = vld [vmem:[#allocation11 + $0xd8] sm:$0xff]  ;;  %v1377_v29 = vld [vmem:[#allocation11 + $0xc0] sm:$0xff]  ;;  %v1379_v30 = vld [vmem:[#allocation11 + $0xd0] sm:$0xff] }
 0x1bd   : > { %v1374_v31 = vld [vmem:[#allocation11 + $0xa8] sm:$0xff] }
 0x1be   : > { %3947 = vrcp.f32 %v1064_v32  ;;  %v1187_v34 = vrot.slane %v1186_v33, 1  ;;  %v1376_v32 = vld [vmem:[#allocation11 + $0xb8] sm:$0xff] }
 0x1c0   : > { %v1188_v35 = vadd.f32 %v1187_v34, %v1186_v33  ;;  %v1375_v33 = vld [vmem:[#allocation11 + $0xb0] sm:$0xff] }
 0x1c2   : > { %3949 = vrcp.f32 %v1188_v35 }
 0x1cb   : > { %v3948_v36 = vpop.eup %3947 }
 0x1cc   : > { %v1066_v37 = vmul.f32 %v3948_v36, %v3940_v14  ;;  %v1067_v38 = vmul.f32 %v3948_v36, %v3942_v15  ;;  %v1395_v14 = vld [vmem:[#allocation11 + $0x150] sm:$0xff]  ;;  %v1390_v15 = vld [vmem:[#allocation11 + $0x128] sm:$0xff] }
 0x1ce   : > { %1068 = vst.msk [vmem:[#allocation2] sm:$0xff] %vm1040_vm1, %v1066_v37  ;;  %3626 = vmatprep.mubr.msk.f32.mxu1 %vm1040_vm1, %v1066_v37  ;;  %1069 = vst.msk [vmem:[#allocation2 + $0x8] sm:$0xff] %vm1040_vm1, %v1067_v38  ;;  %v1070_v44 = vsel %vm1040_vm1, %v1066_v37, 0.0  ;;  %v1073_v45 = vsel %vm1040_vm1, %v1067_v38, 0.0 }
 0x1cf   : > { %v3950_v39 = vpop.eup %3949  ;;  %3627 = vmatmul.mubr.msk.f32.vlgmr.msra.gmra.mxu1 %vm1040_vm1, %v1067_v38 }
 0x1d0   : > { %v1190_v40 = vmul.f32 %v3950_v39, %v3944_v19  ;;  %v1191_v41 = vmul.f32 %v3950_v39, %v3946_v20  ;;  %1418 = vmatpush1.msra.mxu1 %v1413_v56  ;;  %v1386_v19 = vld [vmem:[#allocation11 + $0x108] sm:$0xff]  ;;  %v1388_v20 = vld [vmem:[#allocation11 + $0x118] sm:$0xff]  ;;  %v1367_v56 = vld [vmem:[#allocation11 + $0x70] sm:$0xff] }
 0x1d1   : > { %1419 = vmatprep.subr.mxu1 %v1410_v58  ;;  %v1364_v58 = vld [vmem:[#allocation11 + $0x58] sm:$0xff] }
 0x1d2   : > { %1193 = vst.msk [vmem:[#allocation2 + $0x10] sm:$0xff] %vm1040_vm1, %v1190_v40  ;;  %v1195_v42 = vsel %vm1040_vm1, %v1190_v40, 0.0  ;;  %3645 = vmatprep.mubr.msk.f32.mxu0 %vm1040_vm1, %v1190_v40  ;;  %1194 = vst.msk [vmem:[#allocation2 + $0x18] sm:$0xff] %vm1040_vm1, %v1191_v41  ;;  %v1198_v43 = vsel %vm1040_vm1, %v1191_v41, 0.0  ;;  %1420 = vmatpush1.msra.mxu1 %v1409_v60  ;;  %v1363_v60 = vld [vmem:[#allocation11 + $0x50] sm:$0xff] }
 0x1d3   : > { %1196 = vadd.xlane.f32.xlu0 %v1195_v42  ;;  %1199 = vadd.xlane.f32.xlu1 %v1198_v43 }
 0x1d4   : > { %1421 = vmatprep.subr.mxu1 %v1406_v62  ;;  %v1360_v62 = vld [vmem:[#allocation11 + $0x38] sm:$0xff] }
 0x1d5   : > { %1422 = vmatpush1.msra.mxu1 %v1405_v0  ;;  %v1359_v0 = vld [vmem:[#allocation11 + $0x30] sm:$0xff] }
 0x1d6   : > { %1423 = vmatprep.subr.mxu1 %v1402_v3  ;;  %v1356_v3 = vld [vmem:[#allocation11 + $0x18] sm:$0xff] }
 0x1d7   : > { %1071 = vadd.xlane.f32.xlu0 %v1070_v44  ;;  %1424 = vmatpush1.msra.mxu1 %v1401_v5  ;;  %v1355_v5 = vld [vmem:[#allocation11 + $0x10] sm:$0xff] }
 0x1d8   : > { %1425 = vmatprep.subr.mxu1 %v1398_v7 }
 0x1d9   : > { %1426 = vmatpush1.msra.mxu1 %v1397_v9 }
 0x1da   : > { %1427 = vmatprep.subr.mxu1 %v1394_v11 }
 0x1db   : > { %1074 = vadd.xlane.f32.xlu0 %v1073_v45  ;;  %1428 = vmatpush1.msra.mxu1 %v1393_v13  ;;  %v2028_v13 = vld [vmem:[#allocation17] sm:$0x3] }
 0x1dc   : > { %1429 = vmatprep.subr.mxu1 %v1390_v15 }
 0x1dd   : > { %1430 = vmatpush1.msra.mxu1 %v1389_v17 }
 0x1de   : > { %1431 = vmatprep.subr.mxu1 %v1386_v19 }
 0x1df   : > { %1432 = vmatpush1.msra.mxu1 %v1385_v21  ;;  %v1571_v21 = vld [vmem:[#allocation14] sm:$0x77] }
 0x1e0   : > { %1433 = vmatprep.subr.mxu1 %v1382_v23 }
 0x1e1   : > { %1434 = vmatpush1.msra.mxu1 %v1381_v25 }
 0x1e2   : > { %1435 = vmatprep.subr.mxu1 %v1378_v27 }
 0x1e3   : > { %1436 = vmatpush1.msra.mxu1 %v1377_v29 }
 0x1e4   : > { %1437 = vmatprep.subr.mxu1 %v1374_v31 }
 0x1e8   : > { %v1220_v47 = vpop.permute.xlu0 %1219 }
 0x1ec   : > { %v1224_v46 = vpop.permute.xlu1 %1223  ;;  %v1216_v49 = vpop.permute.xlu0 %1215 }
 0x1ed   : > { %3629 = vmatprep.subr.mxu0 %v1224_v46 }
 0x1ee   : > { %3630 = vmatpush3.msra.mxu0 %v1224_v46 }
 0x1f0   : > { %v1212_v52 = vpop.permute.xlu0 %1211 }
 0x1f1   : > { %v1222_v48 = vpop.permute.xlu1 %1221 }
 0x1f2   : > { %3631 = vmatprep.subr.mxu0 %v1222_v48 }
 0x1f3   : > { %3632 = vmatpush3.msra.mxu0 %v1222_v48  ;;  %v1373_v48 = vld [vmem:[#allocation11 + $0xa0] sm:$0xff] }
 0x1f4   : > { %3633 = vmatprep.subr.mxu0 %v1220_v47  ;;  %1438 = vmatpush1.msra.mxu1 %v1373_v48 }
 0x1f5   : > { %3634 = vmatpush3.msra.mxu0 %v1220_v47  ;;  %v1218_v50 = vpop.permute.xlu1 %1217 }
 0x1f6   : > { %3635 = vmatprep.subr.mxu0 %v1218_v50 }
 0x1f7   : > { %3636 = vmatpush3.msra.mxu0 %v1218_v50  ;;  %v1372_v50 = vld [vmem:[#allocation11 + $0x98] sm:$0xff] }
 0x1f8   : > { %3637 = vmatprep.subr.mxu0 %v1216_v49 }
 0x1f9   : > { %3638 = vmatpush3.msra.mxu0 %v1216_v49  ;;  %v1214_v51 = vpop.permute.xlu1 %1213  ;;  %v1370_v49 = vld [vmem:[#allocation11 + $0x88] sm:$0xff] }
 0x1fa   : > { %3639 = vmatprep.subr.mxu0 %v1214_v51  ;;  %1439 = vmatprep.subr.mxu1 %v1370_v49 }
 0x1fb   : > { %3640 = vmatpush3.msra.mxu0 %v1214_v51  ;;  %v1371_v51 = vld [vmem:[#allocation11 + $0x90] sm:$0xff] }
 0x1fc   : > { %3641 = vmatprep.subr.mxu0 %v1212_v52 }
 0x1fd   : > { %3642 = vmatpush3.msra.mxu0 %v1212_v52  ;;  %v1210_v53 = vpop.permute.xlu1 %1209  ;;  %v1369_v52 = vld [vmem:[#allocation11 + $0x80] sm:$0xff] }
 0x1fe   : > { %3643 = vmatprep.subr.mxu0 %v1210_v53  ;;  %1440 = vmatpush1.msra.mxu1 %v1369_v52 }
 0x1ff   : > { %3644 = vmatpush3.msra.mxu0 %v1210_v53  ;;  %v1366_v53 = vld [vmem:[#allocation11 + $0x68] sm:$0xff] }
 0x200   : > { %3646 = vmatmul.mubr.msk.f32.vlgmr.msra.gmra.mxu0 %vm1040_vm1, %v1191_v41  ;;  %1494 = vmatprep.subr.mxu0 %v1416_v55  ;;  %v1365_v55 = vld [vmem:[#allocation11 + $0x60] sm:$0xff] }
 0x201   : > { %1495 = vmatpush1.msra.mxu0 %v1415_v57  ;;  %1441 = vmatprep.subr.mxu1 %v1366_v53  ;;  %v1362_v57 = vld [vmem:[#allocation11 + $0x48] sm:$0xff] }
 0x202   : > { %1496 = vmatprep.subr.mxu0 %v1412_v59  ;;  %1442 = vmatpush1.msra.mxu1 %v1365_v55  ;;  %v1361_v59 = vld [vmem:[#allocation11 + $0x40] sm:$0xff] }
 0x203   : > { %1497 = vmatpush1.msra.mxu0 %v1411_v61  ;;  %1443 = vmatprep.subr.mxu1 %v1362_v57  ;;  %v1358_v61 = vld [vmem:[#allocation11 + $0x28] sm:$0xff] }
 0x204   : > { %1498 = vmatprep.subr.mxu0 %v1408_v63  ;;  %v1357_v63 = vld [vmem:[#allocation11 + $0x20] sm:$0xff]  ;;  %1444 = vmatpush1.msra.mxu1 %v1361_v59 }
 0x205   : > { %1499 = vmatpush1.msra.mxu0 %v1407_v2  ;;  %v1354_v2 = vld [vmem:[#allocation11 + $0x8] sm:$0xff]  ;;  %1445 = vmatprep.subr.mxu1 %v1358_v61 }
 0x206   : > { %1500 = vmatprep.subr.mxu0 %v1404_v4  ;;  %v1353_v4 = vld [vmem:[#allocation11] sm:$0xff]  ;;  %1446 = vmatpush1.msra.mxu1 %v1357_v63 }
 0x207   : > { %1501 = vmatpush1.msra.mxu0 %v1403_v6  ;;  %1447 = vmatprep.subr.mxu1 %v1354_v2  ;;  %v4315_v6 = vmov 0.0  }
 0x208   : > { %1502 = vmatprep.subr.mxu0 %v1400_v8  ;;  %1448 = vmatpush1.msra.mxu1 %v1353_v4 }
 0x209   : > { %1503 = vmatpush1.msra.mxu0 %v1399_v10  ;;  %1481 = vmatprep.mubr.f32.mxu1 %v4315_v6 }
 0x20a   : > { %1504 = vmatprep.subr.mxu0 %v1396_v12  ;;  %1558 = vmatprep.mubr.f32.mxu0 %v4315_v6 }
 0x20b   : > { %1505 = vmatpush1.msra.mxu0 %v1395_v14 }
 0x20c   : > { %1506 = vmatprep.subr.mxu0 %v1392_v16 }
 0x20d   : > { %1507 = vmatpush1.msra.mxu0 %v1391_v18  ;;  %v1333_v18 = vlaneseq }
 0x20e   : > { %1508 = vmatprep.subr.mxu0 %v1388_v20 }
 0x20f   : > { %1509 = vmatpush1.msra.mxu0 %v1387_v22  ;;  %v4689_v19 = vshrl.u32 %v1333_v18, 7 }
 0x210   : > { %1510 = vmatprep.subr.mxu0 %v1384_v24 }
 0x211   : > { %1511 = vmatpush1.msra.mxu0 %v1383_v26  ;;  %v1649_v20 = vsub.s32 2, %v4689_v19  ;;  %v4695_v24 = vsub.s32 1, %v4689_v19  ;;  %v1627_v25 = vsub.s32 5, %v4689_v19  ;;  %v1605_v26 = vsub.s32 4, %v4689_v19 }
 0x212   : > { %1512 = vmatprep.subr.mxu0 %v1380_v28  ;;  %v1335_v27 = vadd.s32 8, %v4689_v19  ;;  %v4701_v28 = vsub.s32 0, %v4689_v19  ;;  %v1653_v29 = vsub.s32 6, %v4689_v19  ;;  %vm1336_vm3 = vcmp.gt.s32.totalorder %v4689_v19, 0 }
 0x213   : > { %1513 = vmatpush1.msra.mxu0 %v1379_v30  ;;  %v1650_v22 = vrot.slane %v1571_v21, %v1649_v20  ;;  %v1628_v30 = vrot.slane %v1571_v21, %v1627_v25  ;;  %v1624_v31 = vrot.slane %v1571_v21, %v4695_v24  ;;  %vm1576_vm5 = vcmp.lt.s32.totalorder %v4689_v19, 1 }
 0x214   : > { %1514 = vmatprep.subr.mxu0 %v1376_v32  ;;  %v1606_v32 = vrot.slane %v1571_v21, %v1605_v26  ;;  %vm1343_vm4 = vcmp.lt.s32.totalorder %v1335_v27, 15  ;;  %vm1589_vm6 = vcmp.lt.s32.totalorder %v4689_v19, 7  ;;  %v2572_v19 = vld [vmem:[%s5037_s16 + $0x58] sm:$0xff] }
 0x215   : > { %1515 = vmatpush1.msra.mxu0 %v1375_v33  ;;  %v4692_v23 = vrot.slane %v1650_v22, %v1649_v20 }
 0x216   : > { %1516 = vmatprep.subr.mxu0 %v1372_v50  ;;  %v1616_v48 = vrot.slane %v1606_v32, %v4701_v28 }
 0x217   : > { %1517 = vmatpush1.msra.mxu0 %v1371_v51 }
 0x218   : > { %1518 = vmatprep.subr.mxu0 %v1368_v54 }
 0x219   : > { %1519 = vmatpush1.msra.mxu0 %v1367_v56 }
 0x21a   : > { %1520 = vmatprep.subr.mxu0 %v1364_v58 }
 0x21b   : > { %1521 = vmatpush1.msra.mxu0 %v1363_v60 }
 0x21c   : > { %1522 = vmatprep.subr.mxu0 %v1360_v62 }
 0x21d   : > { %1523 = vmatpush1.msra.mxu0 %v1359_v0 }
 0x21e   : > { %1524 = vmatprep.subr.mxu0 %v1356_v3 }
 0x21f   : > { %1525 = vmatpush1.msra.mxu0 %v1355_v5 }
 0x25c   : > { %v1197_v34 = vpop.xlane.xlu0 %1196  ;;  %v1200_v45 = vpop.xlane.xlu1 %1199 }
 0x25d   : > { %v1315_v46 = vadd.f32 1e-05, %v1200_v45  ;;  %v1314_v47 = vadd.f32 1e-05, %v1197_v34 }
 0x260   : > { %v1072_v35 = vpop.xlane.xlu0 %1071 }
 0x261   : > { %v1157_v38 = vadd.f32 1e-05, %v1072_v35  ;;  %v1654_v35 = vrot.slane %v1571_v21, %v1653_v29 }
 0x263   : > { %v1664_v49 = vrot.slane %v1654_v35, %v1649_v20 }
 0x264   : > { %v1075_v36 = vpop.xlane.xlu0 %1074 }
 0x265   : > { %v1158_v37 = vadd.f32 1e-05, %v1075_v36  ;;  %v1602_v36 = vrot.slane %v1571_v21, %v4701_v28 }
 0x267   : > { %3951 = vrcp.f32 %v1158_v37  ;;  %v3397_v37 = vld [vmem:[#allocation15] ss:$0 sm:$0xff]  ;;  %v1612_v50 = vrot.slane %v1602_v36, %v4701_v28 }
 0x268   : > { %3953 = vrcp.f32 %v1157_v38  ;;  %v1638_v38 = vrot.slane %v1628_v30, %v4695_v24 }
 0x269   : > { %3955 = vrcp.f32 %v1315_v46 }
 0x26a   : > { %3957 = vrcp.f32 %v1314_v47 }
 0x274   : > { %v3952_v39 = vpop.eup %3951 }
 0x275   : > { %v3954_v42 = vpop.eup %3953 }
 0x276   : > { %v3956_v7 = vpop.eup %3955 }
 0x277   : > { %v3958_v10 = vpop.eup %3957 }
 0x28f   : > { %v3628_v40 = vpop.f32.mrf.mxu1 }
 0x290   : > { %v1162_v41 = vmul.f32 %v3952_v39, %v3628_v40  ;;  %v1634_v40 = vrot.slane %v1624_v31, %v4695_v24 }
 0x291   : > { %v1148_v43 = vpop.f32.mrf.mxu1 }
 0x292   : > { %1164 = vst.msk [vmem:[#allocation3 + $0x8] sm:$0xff] %vm1040_vm1, %v1162_v41  ;;  %v1160_v44 = vmul.f32 %v3954_v42, %v1148_v43  ;;  %v1673_v42 = vld [vmem:[%s5029_s8] sm:$0x3]  ;;  %v4715_v43 = vsel %vm1336_vm3, 1.0, %v4315_v6 }
 0x293   : > { %v1682_v54 = vrot.slane %v1673_v42, %v4695_v24 }
 0x294   : > { %1163 = vst.msk [vmem:[#allocation3] sm:$0xff] %vm1040_vm1, %v1160_v44  ;;  %v4718_v44 = vsel %vm1343_vm4, 1.0, %v4315_v6 }
 0x2c0   : > { %v3647_v8 = vpop.f32.mrf.mxu0 }
 0x2c1   : > { %v1319_v9 = vmul.f32 %v3956_v7, %v3647_v8 }
 0x2c2   : > { %v1305_v11 = vpop.f32.mrf.mxu0 }
 0x2c3   : > { %v1317_v12 = vmul.f32 %v3958_v10, %v1305_v11  ;;  %1324 = vrot.lane.b32.xlu0 %v1319_v9, %s4314_s22 }
 0x2c5   : > { %1322 = vrot.lane.b32.xlu1 %v1317_v12, %s4314_s22 }
 0x2c7   : > { %2031 = vperm.xlu0 %3933, %v2028_v13  }
 0x335   : > { %v1325_v14 = vpop.permute.xlu0 %1324 }
 0x336   : > { %1330 = vst.msk [vmem:[#allocation3 + $0x8] sm:$0xff] %vm1328_vm2, %v1325_v14 }
 0x337   : > { %v1323_v15 = vpop.permute.xlu1 %1322 }
 0x338   : > { %1329 = vst.msk [vmem:[#allocation3] sm:$0xff] %vm1328_vm2, %v1323_v15 }
 0x33d   : > { %v4685_v17 = vld [vmem:[#allocation3 + $0x8] sm:$0xff] }
 0x33f   : > { %v4679_v16 = vld [vmem:[#allocation3] sm:$0xff] }
 0x340   : > { %1482 = vmatmul.mubr.f32.vlgmr.msra.gmra.mxu1 %v4679_v16  ;;  %1559 = vmatmul.mubr.f32.vlgmr.msra.gmra.mxu0 %v4679_v16 }
 0x341   : > { %1487 = vmatprep.mubr.f32.mxu1 %v4315_v6  ;;  %1564 = vmatprep.mubr.f32.mxu0 %v4315_v6 }
 0x344   : > { %1488 = vmatmul.mubr.f32.gmra.mxu1 %v4685_v17  ;;  %1565 = vmatmul.mubr.f32.gmra.mxu0 %v4685_v17 }
 0x400   : > { %v4705_v33 = vpop.f32.mrf.mxu1  ;;  %v1560_v34 = vpop.f32.mrf.mxu0 }
 0x401   : > { %v1573_v51 = vrot.slane %v1560_v34, 7  ;;  %v1586_v55 = vrot.slane %v1560_v34, 1  ;;  %v1640_v56 = vmul.f32 %v1638_v38, %v1560_v34 }
 0x402   : > { %v1485_v39 = vpop.f32.mrf.mxu1  ;;  %v1562_v41 = vpop.f32.mrf.mxu0 }
 0x403   : > { %v4722_v45 = vadd.f32 %v3397_v37, %v1562_v41  ;;  %v1572_v57 = vrot.slane %v1485_v39, 7  ;;  %v1585_v60 = vrot.slane %v1485_v39, 1  ;;  %v1639_v5 = vmul.f32 %v1634_v40, %v1485_v39 }
 0x404   : > { %v4724_v46 = vpop.f32.mrf.mxu1  ;;  %v1566_v47 = vpop.f32.mrf.mxu0  ;;  %v1678_v39 = vrot.slane %v1673_v42, %v4701_v28 }
 0x405   : > { %v1575_v52 = vrot.slane %v1566_v47, 7  ;;  %v1588_v53 = vrot.slane %v1566_v47, 1  ;;  %v1839_v58 = vand.u32 2147483647, %v4722_v45  ;;  %v1642_v63 = vmul.f32 %v1638_v38, %v1566_v47 }
 0x406   : > { %v1491_v59 = vpop.f32.mrf.mxu1  ;;  %v1568_v14 = vpop.f32.mrf.mxu0 }
 0x407   : > { %v1578_v61 = vsel %vm1576_vm5, %v1573_v51, %v1575_v52  ;;  %v1580_v62 = vsel %vm1576_vm5, %v1575_v52, %v1573_v51  ;;  %v1841_v0 = vsub.f32 0.0, %v1839_v58  ;;  %v1593_v3 = vsel %vm1589_vm6, %v1588_v53, %v1586_v55 }
 0x408   : > { %v1582_v2 = vmul.f32 %v4715_v43, %v1580_v62  ;;  %v1620_v4 = vmul.f32 %v1616_v48, %v1578_v61  ;;  %v1597_v7 = vmul.f32 %v4718_v44, %v1593_v3  ;;  %v1574_v8 = vrot.slane %v1491_v59, 7 }
 0x409   : > { %v1587_v9 = vrot.slane %v1491_v59, 1  ;;  %v1843_v10 = vmul.f32 1.442695, %v1841_v0  ;;  %v1591_v11 = vsel %vm1589_vm6, %v1586_v55, %v1588_v53  ;;  %v1641_v21 = vmul.f32 %v1634_v40, %v1491_v59 }
 0x40a   : > { %v1618_v12 = vmul.f32 %v1616_v48, %v1582_v2  ;;  %v1646_v13 = vadd.f32 %v1642_v63, %v1620_v4  ;;  %v1668_v15 = vmul.f32 %v1664_v49, %v1597_v7  ;;  %v1577_v18 = vsel %vm1576_vm5, %v1572_v57, %v1574_v8 }
 0x40b   : > { %v1579_v20 = vsel %vm1576_vm5, %v1574_v8, %v1572_v57  ;;  %v1590_v25 = vsel %vm1589_vm6, %v1585_v60, %v1587_v9  ;;  %v1592_v26 = vsel %vm1589_vm6, %v1587_v9, %v1585_v60  ;;  %v1619_v27 = vmul.f32 %v1612_v50, %v1577_v18 }
 0x40c   : > { %v1581_v22 = vmul.f32 %v4715_v43, %v1579_v20  ;;  %3959 = vpow2.f32 %v1843_v10  ;;  %v1672_v29 = vadd.f32 %v1668_v15, %v1646_v13  ;;  %v1596_v30 = vmul.f32 %v4718_v44, %v1592_v26  ;;  %v3398_v15 = vld [vmem:[#allocation18] ss:$0 sm:$0xff] }
 0x40d   : > { %v1836_v31 = vadd.f32 %v3397_v37, %v1568_v14  ;;  %v1666_v32 = vmul.f32 %v1664_v49, %v1591_v11  ;;  %v1645_v35 = vadd.f32 %v1641_v21, %v1619_v27  ;;  %v1644_v36 = vadd.f32 %v1640_v56, %v1618_v12  ;;  %v4758_v11 = vld [vmem:[#allocation21 + $0x10] sm:$0xff]  ;;  %v4768_v20 = vld [vmem:[#allocation21 + $0x18] sm:$0xff] }
 0x40e   : > { %v1617_v34 = vmul.f32 %v1612_v50, %v1581_v22  ;;  %v1667_v38 = vmul.f32 %v4692_v23, %v1596_v30  ;;  %v1688_v41 = vadd.f32 %v1682_v54, %v1672_v29  ;;  %v1665_v48 = vmul.f32 %v4692_v23, %v1590_v25  ;;  %3666 = vmatprep.mubr.msk.f32.mxu0 %vm1864_vm7, %v4758_v11  ;;  %v2113_v21 = vld [vmem:[#allocation20] sm:$0x3] }
 0x40f   : > { %v1840_v40 = vand.u32 2147483647, %v1836_v31  ;;  %v1670_v51 = vadd.f32 %v1666_v32, %v1644_v36  ;;  %v1837_v8 = vmax.f32 %v4722_v45, 0.0  ;;  %v1838_v9 = vmax.f32 %v1836_v31, 0.0  ;;  %v4782_v32 = vld [vmem:[#allocation21] sm:$0xff] }
 0x410   : > { %v1643_v47 = vadd.f32 %v1639_v5, %v1617_v34  ;;  %v1671_v52 = vadd.f32 %v1667_v38, %v1645_v35  ;;  %v3390_v55 = vmul.f32 -1.442695, %v1688_v41  ;;  %v4787_v35 = vld [vmem:[#allocation21 + $0x8] sm:$0xff] }
 0x411   : > { %v1842_v53 = vsub.f32 0.0, %v1840_v40  ;;  %v1686_v58 = vadd.f32 %v1682_v54, %v1670_v51  ;;  %v2027_v40 = vld [vmem:[#allocation12] sm:$0x3] }
 0x412   : > { %v1669_v57 = vadd.f32 %v1665_v48, %v1643_v47  ;;  %v4753_v37 = vadd.f32 %v1678_v39, %v1671_v52  ;;  %3961 = vpow2.f32 %v3390_v55  ;;  %v4317_v52 = vmov 1   ;;  %v2032_v55 = vpop.permute.xlu0 %2031 }
 0x413   : > { %v1845_v49 = vmul.f32 1.442695, %v1842_v53  ;;  %v3388_v56 = vmul.f32 -1.442695, %v1686_v58 }
 0x414   : > { %v4755_v50 = vadd.f32 %v1678_v39, %v1669_v57  ;;  %v3389_v22 = vmul.f32 -1.442695, %v4753_v37 }
 0x415   : > { %3963 = vpow2.f32 %v1845_v49 }
 0x416   : > { %3965 = vpow2.f32 %v3388_v56  ;;  %v3387_v25 = vmul.f32 -1.442695, %v4755_v50 }
 0x419   : > { %v3960_v42 = vpop.eup %3959 }
 0x41a   : > { %v1847_v59 = vadd.f32 1.0, %v3960_v42 }
 0x41c   : > { %3967 = vlog2.f32 %v1847_v59 }
 0x41f   : > { %v3962_v60 = vpop.eup %3961 }
 0x420   : > { %v1704_v61 = vadd.f32 1.0, %v3962_v60  ;;  %v3395_v60 = vld [vmem:[%s5034_s13] ss:$0 sm:$0xff] }
 0x422   : > { %v3964_v23 = vpop.eup %3963  ;;  %3969 = vrcp.f32 %v1704_v61 }
 0x423   : > { %v3966_v62 = vpop.eup %3965  ;;  %v1848_v63 = vadd.f32 1.0, %v3964_v23 }
 0x424   : > { %v1702_v0 = vadd.f32 1.0, %v3966_v62 }
 0x425   : > { %3971 = vlog2.f32 %v1848_v63 }
 0x426   : > { %3973 = vrcp.f32 %v1702_v0 }
 0x427   : > { %3975 = vpow2.f32 %v3389_v22 }
 0x428   : > { %3977 = vpow2.f32 %v3387_v25 }
 0x429   : > { %v3968_v54 = vpop.eup %3967 }
 0x42a   : > { %v1850_v3 = vmul.f32 0.6931472, %v3968_v54 }
 0x42c   : > { %v1853_v13 = vadd.f32 %v1850_v3, %v1837_v8  ;;  %v3396_v8 = vld [vmem:[#allocation6] ss:$0 sm:$0xff] }
 0x42e   : > { %v1862_v18 = vmul.f32 %v3398_v15, %v1853_v13 }
 0x42f   : > { %v3970_v2 = vpop.eup %3969 }
 0x430   : > { %v1716_v5 = vmul.f32 %v3970_v2, %v1688_v41 }
 0x432   : > { %v3972_v4 = vpop.eup %3971  ;;  %3648 = vmatprep.subr.msk.mxu1 %vm1040_vm1, %v1716_v5 }
 0x433   : > { %v3974_v7 = vpop.eup %3973  ;;  %v1852_v10 = vmul.f32 0.6931472, %v3972_v4  ;;  %3649 = vmatpush3.xpose.msk.msra.mxu1 %vm1040_vm1, %v1716_v5 }
 0x434   : > { %v1714_v12 = vmul.f32 %v3974_v7, %v1686_v58  ;;  %v3976_v26 = vpop.eup %3975 }
 0x435   : > { %v1854_v14 = vadd.f32 %v1852_v10, %v1838_v9  ;;  %v1703_v27 = vadd.f32 1.0, %v3976_v26  ;;  %v3978_v29 = vpop.eup %3977 }
 0x436   : > { %1719 = vrot.lane.b32.xlu1 %v1714_v12, %s4314_s22  ;;  %3650 = vmatprep.subr.msk.mxu1 %vm1040_vm1, %v1714_v12  ;;  %v1701_v30 = vadd.f32 1.0, %v3978_v29 }
 0x437   : > { %v1863_v45 = vmul.f32 %v3398_v15, %v1854_v14  ;;  %3651 = vmatpush3.xpose.msk.msra.mxu1 %vm1040_vm1, %v1714_v12  ;;  %3979 = vrcp.f32 %v1703_v27 }
 0x438   : > { %3981 = vrcp.f32 %v1701_v30 }
 0x439   : > { %3662 = vmatprep.subr.mxu0 %v1863_v45  ;;  %3655 = vmatprep.subr.mxu1 %v1863_v45 }
 0x43a   : > { %3663 = vmatpush3.msra.mxu0 %v1863_v45  ;;  %1721 = vrot.lane.b32.xlu1 %v1716_v5, %s4314_s22 }
 0x43b   : > { %3664 = vmatprep.subr.mxu0 %v1862_v18 }
 0x43c   : > { %3665 = vmatpush3.msra.mxu0 %v1862_v18 }
 0x43d   : > { %3667 = vmatmul.mubr.msk.f32.vlgmr.msra.gmra.mxu0 %vm1864_vm7, %v4768_v20  ;;  %3676 = vmatprep.subr.mxu0 %v4315_v6 }
 0x43e   : > { %2116 = vperm.xlu1 %3934, %v2113_v21   ;;  %3677 = vmatpush3.msra.mxu0 %v4768_v20 }
 0x43f   : > { %3678 = vmatprep.subr.mxu0 %v4315_v6  ;;  %3680 = vmatprep.mubr.msk.f32.mxu0 %vm4316_vm8, %v4315_v6 }
 0x440   : > { %3679 = vmatpush3.msra.mxu0 %v4758_v11 }
 0x441   : > { %3683 = vmatprep.subr.mxu0 %v4315_v6 }
 0x444   : > { %v3980_v36 = vpop.eup %3979 }
 0x445   : > { %v4797_v38 = vmul.f32 %v3980_v36, %v4753_v37  ;;  %v3982_v39 = vpop.eup %3981 }
 0x446   : > { %v4802_v41 = vmul.f32 %v3982_v39, %v4755_v50 }
 0x447   : > { %v1814_v23 = vmul.f32 %v3395_v60, %v4797_v38 }
 0x448   : > { %v1813_v61 = vmul.f32 %v3395_v60, %v4802_v41 }
 0x4a8   : > { %v1720_v31 = vpop.permute.xlu1 %1719 }
 0x4a9   : > { %3652 = vmatprep.mubr.msk.f32.mxu1 %vm1040_vm1, %v1720_v31 }
 0x4ac   : > { %v1722_v34 = vpop.permute.xlu1 %1721 }
 0x4ad   : > { %3653 = vmatmul.mubr.msk.f32.vlgmr.msra.gmra.mxu1 %vm1040_vm1, %v1722_v34 }
 0x4ae   : > { %3656 = vmatpush3.msra.mxu1 %v1863_v45  ;;  %3659 = vmatprep.mubr.msk.f32.mxu1 %vm1864_vm7, %v4782_v32 }
 0x4af   : > { %3657 = vmatprep.subr.mxu1 %v1862_v18 }
 0x4b0   : > { %3658 = vmatpush3.msra.mxu1 %v1862_v18 }
 0x4b1   : > { %3669 = vmatprep.subr.mxu1 %v4315_v6  ;;  %3660 = vmatmul.mubr.msk.f32.vlgmr.msra.gmra.mxu1 %vm1864_vm7, %v4787_v35 }
 0x4b2   : > { %3670 = vmatpush3.xpose.msra.mxu1 %v4685_v17  ;;  %3673 = vmatprep.mubr.msk.f32.mxu1 %vm4316_vm8, %v4315_v6 }
 0x4b3   : > { %3671 = vmatprep.subr.mxu1 %v4315_v6 }
 0x4b6   : > { %3672 = vmatpush3.xpose.msra.mxu1 %v4679_v16 }
 0x4b7   : > { %3690 = vmatprep.subr.mxu1 %v4797_v38 }
 0x4b9   : > { %3674 = vmatmul.mubr.f32.vlgmr.msra.gmra.mxu1 %v2027_v40  ;;  %v2117_v54 = vpop.permute.xlu1 %2116 }
 0x4ba   : > { %3691 = vmatpush3.msra.mxu1 %v4797_v38 }
 0x4bb   : > { %3692 = vmatprep.subr.mxu1 %v4802_v41 }
 0x4bc   : > { %3693 = vmatpush3.msra.mxu1 %v4802_v41 }
 0x4fd   : > { %v3668_v16 = vpop.f32.mrf.mxu0 }
 0x4ff   : > { %v2018_v53 = vpop.f32.mrf.mxu0 }
 0x56d   : > { %v4807_v17 = vpop.f32.mrf.mxu1 }
 0x56f   : > { %v4809_v47 = vpop.f32.mrf.mxu1 }
 0x571   : > { %v3661_v48 = vpop.f32.mrf.mxu1 }
 0x572   : > { %2270 = vperm.xlu1 %3934, %v3661_v48  }
 0x573   : > { %v1937_v51 = vpop.f32.mrf.mxu1 }
 0x574   : > { %2265 = vperm.xlu0 %3933, %v1937_v51  }
 0x576   : > { %3936 = vset.pattern.permute.xlu1 %v4317_v52 }
 0x577   : > { %2286 = vperm.xlu1 %3936, %v3668_v16  }
 0x578   : > { %3935 = vset.pattern.permute.xlu0 %v4317_v52 }
 0x579   : > { %v2100_v57 = vpop.f32.mrf.mxu1  ;;  %2281 = vperm.xlu0 %3935, %v2018_v53  }
 0x57a   : > { %v2101_v58 = vadd.f32 %v2100_v57, %v2032_v55 }
 0x57b   : > { %v3675_v37 = vpop.f32.mrf.mxu1  ;;  %3938 = vset.pattern.permute.xlu1 %v4313_v1 }
 0x57c   : > { %v2105_v49 = vand.u32 2147483647, %v2101_v58  ;;  %v2104_v63 = vmax.f32 %v2101_v58, 0.0 }
 0x57d   : > { %3937 = vset.pattern.permute.xlu0 %v4313_v1 }
 0x57e   : > { %v2106_v50 = vsub.f32 0.0, %v2105_v49 }
 0x580   : > { %v2107_v56 = vmul.f32 1.442695, %v2106_v50 }
 0x582   : > { %3983 = vpow2.f32 %v2107_v56 }
 0x58f   : > { %v3984_v42 = vpop.eup %3983 }
 0x590   : > { %v2109_v59 = vadd.f32 1.0, %v3984_v42 }
 0x592   : > { %3985 = vlog2.f32 %v2109_v59 }
 0x598   : > { %1817 = vadd.xlane.f32.xlu0 %v1814_v23 }
 0x59b   : > { %1815 = vadd.xlane.f32.xlu1 %v1813_v61  ;;  %v3410_v61 = vmul.f32 -1.442695, %v4724_v46 }
 0x59f   : > { %v3986_v62 = vpop.eup %3985 }
 0x5a0   : > { %v2111_v0 = vmul.f32 0.6931472, %v3986_v62 }
 0x5a2   : > { %v2112_v1 = vadd.f32 %v2111_v0, %v2104_v63 }
 0x5a4   : > { %v2119_v2 = vmul.f32 %v2117_v54, %v2112_v1  ;;  %v2316_v55 = vrot.slane %v2112_v1, %v4701_v28  ;;  %v2324_v60 = vrot.slane %v2112_v1, %v4695_v24 }
 0x5a6   : > { %3681 = vmatmul.mubr.msk.f32.vlgmr.msra.gmra.mxu0 %vm1864_vm7, %v2119_v2 }
 0x5a7   : > { %3684 = vmatpush3.msra.mxu0 %v4787_v35  ;;  %3687 = vmatprep.mubr.msk.f32.mxu0 %vm4316_vm8, %v4315_v6 }
 0x5a8   : > { %3685 = vmatprep.subr.mxu0 %v4315_v6 }
 0x5a9   : > { %3686 = vmatpush3.msra.mxu0 %v4782_v32 }
 0x5aa   : > { %3697 = vmatprep.subr.mxu0 %v4797_v38  ;;  %3688 = vmatmul.mubr.msk.f32.vlgmr.msra.gmra.mxu0 %vm1864_vm7, %v2119_v2 }
 0x5ab   : > { %3698 = vmatpush3.msra.mxu0 %v4797_v38 }
 0x5ac   : > { %3699 = vmatprep.subr.mxu0 %v4802_v41 }
 0x5ad   : > { %3700 = vmatpush3.msra.mxu0 %v4802_v41 }
 0x5ed   : > { %v2271_v4 = vpop.permute.xlu1 %2270 }
 0x5ef   : > { %v2266_v3 = vpop.permute.xlu0 %2265 }
 0x5f2   : > { %v2287_v7 = vpop.permute.xlu1 %2286 }
 0x5f4   : > { %v2282_v5 = vpop.permute.xlu0 %2281 }
 0x621   : > { %v1818_v9 = vpop.xlane.xlu0 %1817 }
 0x622   : > { %v1827_v10 = vadd.f32 %v3396_v8, %v1818_v9 }
 0x624   : > { %v1816_v6 = vpop.xlane.xlu1 %1815  ;;  %2510 = vperm.xlu1 %3938, %v1827_v10  }
 0x625   : > { %v1826_v12 = vadd.f32 %v3396_v8, %v1816_v6 }
 0x627   : > { %2505 = vperm.xlu0 %3937, %v1826_v12  }
 0x666   : > { %v2189_v13 = vpop.f32.mrf.mxu0 }
 0x667   : > { %v2276_v14 = vrot.slane %v2189_v13, %v4701_v28 }
 0x668   : > { %v3682_v15 = vpop.f32.mrf.mxu0 }
 0x669   : > { %v2277_v45 = vsub.f32 %v2266_v3, %v2276_v14  ;;  %v2278_v18 = vsub.f32 %v2271_v4, %v2276_v14 }
 0x66a   : > { %v2259_v21 = vpop.f32.mrf.mxu0 }
 0x66b   : > { %v2295_v22 = vmin.f32 %v2277_v45, 0.0  ;;  %v2296_v25 = vmin.f32 %v2278_v18, 0.0  ;;  %v2292_v26 = vrot.slane %v2259_v21, %v4695_v24  ;;  %v2575_v24 = vld [vmem:[%s5037_s16 + $0x70] sm:$0xff] }
 0x66c   : > { %v3689_v27 = vpop.f32.mrf.mxu0 }
 0x66d   : > { %v2297_v29 = vmul.f32 1.442695, %v2295_v22  ;;  %v2299_v30 = vmul.f32 1.442695, %v2296_v25  ;;  %v2293_v31 = vsub.f32 %v2282_v5, %v2292_v26  ;;  %v2294_v34 = vsub.f32 %v2287_v7, %v2292_v26 }
 0x66f   : > { %3987 = vpow2.f32 %v2297_v29  ;;  %v2303_v36 = vmin.f32 %v2293_v31, 0.0  ;;  %v2304_v39 = vmin.f32 %v2294_v34, 0.0 }
 0x670   : > { %3989 = vpow2.f32 %v2299_v30 }
 0x671   : > { %v2305_v40 = vmul.f32 1.442695, %v2303_v36  ;;  %v2307_v48 = vmul.f32 1.442695, %v2304_v39 }
 0x673   : > { %3991 = vpow2.f32 %v2305_v40 }
 0x674   : > { %3993 = vpow2.f32 %v2307_v48  ;;  %v2567_v48 = vld [vmem:[%s5037_s16 + $0x30] sm:$0xff] }
 0x67c   : > { %v3988_v16 = vpop.eup %3987 }
 0x67d   : > { %v3990_v51 = vpop.eup %3989  ;;  %v2301_v52 = vmul.f32 %v3988_v16, %v4782_v32  ;;  %v2566_v16 = vld [vmem:[%s5037_s16 + $0x28] sm:$0xff] }
 0x67e   : > { %v2302_v53 = vmul.f32 %v3990_v51, %v4787_v35  ;;  %v2565_v51 = vld [vmem:[%s5037_s16 + $0x20] sm:$0xff] }
 0x67f   : > { %v2311_v57 = vmul.f32 %v2301_v52, %v4809_v47  ;;  %v2564_v52 = vld [vmem:[%s5037_s16 + $0x18] sm:$0xff] }
 0x680   : > { %v3992_v58 = vpop.eup %3991  ;;  %v2312_v37 = vmul.f32 %v4807_v17, %v2302_v53  ;;  %v2563_v53 = vld [vmem:[%s5037_s16 + $0x10] sm:$0xff] }
 0x681   : > { %v3994_v49 = vpop.eup %3993  ;;  %v2317_v50 = vmul.f32 %v2316_v55, %v2311_v57  ;;  %v2309_v56 = vmul.f32 %v3992_v58, %v4758_v11  ;;  %v2576_v11 = vld [vmem:[%s5037_s16 + $0x78] sm:$0xff]  ;;  %v2561_v57 = vld [vmem:[%s5037_s16] sm:$0xff] }
 0x682   : > { %v2318_v42 = vmul.f32 %v2316_v55, %v2312_v37  ;;  %v2310_v59 = vmul.f32 %v3994_v49, %v4768_v20  ;;  %3704 = vmatprep.subr.mxu1 %v2576_v11  ;;  %v2574_v20 = vld [vmem:[%s5037_s16 + $0x68] sm:$0xff]  ;;  %v2652_v58 = vld [vmem:[#allocation2] sm:$0xff] }
 0x683   : > { %3694 = vmatprep.mubr.msk.f32.mxu1 %vm1864_vm7, %v2317_v50  ;;  %v2319_v32 = vmul.f32 %v2309_v56, %v4809_v47  ;;  %v3409_v47 = vmul.f32 -1.442695, %v4705_v33  ;;  %v2562_v55 = vld [vmem:[%s5037_s16 + $0x8] sm:$0xff] }
 0x684   : > { %3695 = vmatmul.mubr.msk.f32.vlgmr.msra.gmra.mxu1 %vm1864_vm7, %v2318_v42  ;;  %v2320_v28 = vmul.f32 %v4807_v17, %v2310_v59  ;;  %v2573_v17 = vld [vmem:[%s5037_s16 + $0x60] sm:$0xff]  ;;  %v2653_v37 = vld [vmem:[#allocation2 + $0x8] sm:$0xff] }
 0x685   : > { %v2325_v35 = vmul.f32 %v2324_v60, %v2319_v32  ;;  %3705 = vmatpush3.msra.mxu1 %v2576_v11  ;;  %3995 = vpow2.f32 %v3409_v47 }
 0x686   : > { %v2326_v23 = vmul.f32 %v2324_v60, %v2320_v28  ;;  %3706 = vmatprep.subr.mxu1 %v2575_v24  ;;  %3997 = vpow2.f32 %v3410_v61  ;;  %v3411_v28 = vld [vmem:[%s5036_s15] ss:$0 sm:$0xff] }
 0x687   : > { %3701 = vmatprep.mubr.msk.f32.mxu0 %vm1864_vm7, %v2325_v35  ;;  %3707 = vmatpush3.msra.mxu1 %v2575_v24 }
 0x688   : > { %3702 = vmatmul.mubr.msk.f32.vlgmr.msra.gmra.mxu0 %vm1864_vm7, %v2326_v23  ;;  %3708 = vmatprep.subr.mxu1 %v2574_v20 }
 0x689   : > { %3709 = vmatpush3.msra.mxu1 %v2574_v20 }
 0x68a   : > { %3710 = vmatprep.subr.mxu1 %v2573_v17 }
 0x68b   : > { %3711 = vmatpush3.msra.mxu1 %v2573_v17 }
 0x68c   : > { %3712 = vmatprep.subr.mxu1 %v2572_v19 }
 0x68d   : > { %3713 = vmatpush3.msra.mxu1 %v2572_v19  ;;  %v3050_v19 = vld [vmem:[%s5038_s17 + $0x40] sm:$0xff] }
 0x692   : > { %v3996_v62 = vpop.eup %3995 }
 0x693   : > { %v3998_v63 = vpop.eup %3997  ;;  %v2527_v0 = vadd.f32 1.0, %v3996_v62 }
 0x694   : > { %v2528_v1 = vadd.f32 1.0, %v3998_v63 }
 0x695   : > { %3999 = vrcp.f32 %v2527_v0 }
 0x696   : > { %4001 = vrcp.f32 %v2528_v1 }
 0x69f   : > { %v2511_v14 = vpop.permute.xlu1 %2510 }
 0x6a2   : > { %v2506_v9 = vpop.permute.xlu0 %2505  ;;  %v4000_v13 = vpop.eup %3999 }
 0x6a3   : > { %v2513_v18 = vmul.f32 %v2506_v9, %v4802_v41  ;;  %v4002_v25 = vpop.eup %4001  ;;  %v2533_v27 = vmul.f32 %v4000_v13, %v4705_v33  ;;  %v2571_v33 = vld [vmem:[%s5037_s16 + $0x50] sm:$0xff] }
 0x6a4   : > { %v2534_v31 = vmul.f32 %v4002_v25, %v4724_v46  ;;  %3714 = vmatprep.subr.mxu1 %v2571_v33  ;;  %v2569_v46 = vld [vmem:[%s5037_s16 + $0x40] sm:$0xff] }
 0x6a5   : > { %3715 = vmatpush3.msra.mxu1 %v2571_v33  ;;  %v3049_v33 = vld [vmem:[%s5038_s17 + $0x38] sm:$0xff] }
 0x744   : > { %v3696_v54 = vpop.f32.mrf.mxu1 }
 0x745   : > { %v2490_v3 = vrot.slane %v3696_v54, 7 }
 0x746   : > { %v2399_v2 = vpop.f32.mrf.mxu1 }
 0x747   : > { %v2489_v4 = vrot.slane %v2399_v2, 7 }
 0x748   : > { %v3703_v5 = vpop.f32.mrf.mxu0 }
 0x749   : > { %v2492_v7 = vsel %vm1576_vm5, %v2490_v3, %v2489_v4  ;;  %v2496_v10 = vrot.slane %v3703_v5, 1  ;;  %v2491_v26 = vsel %vm1576_vm5, %v2489_v4, %v2490_v3  ;;  %v2823_v4 = vld [vmem:[#allocation2 + $0x10] sm:$0xff]  ;;  %v2824_v5 = vld [vmem:[#allocation2 + $0x18] sm:$0xff] }
 0x74a   : > { %v2480_v8 = vpop.f32.mrf.mxu0  ;;  %v2493_v12 = vmul.f32 %v4715_v43, %v2492_v7  ;;  %v2514_v43 = vmul.f32 %v2511_v14, %v4797_v38  ;;  %v2568_v38 = vld [vmem:[%s5037_s16 + $0x38] sm:$0xff] }
 0x74b   : > { %v2495_v6 = vrot.slane %v2480_v8, 1 }
 0x74d   : > { %v2497_v15 = vsel %vm1589_vm6, %v2495_v6, %v2496_v10  ;;  %v2498_v45 = vsel %vm1589_vm6, %v2496_v10, %v2495_v6 }
 0x74e   : > { %v2500_v21 = vmul.f32 %v4718_v44, %v2498_v45  ;;  %v2501_v22 = vadd.f32 %v2497_v15, %v2493_v12  ;;  %v2570_v44 = vld [vmem:[%s5037_s16 + $0x48] sm:$0xff] }
 0x74f   : > { %3716 = vmatprep.subr.mxu1 %v2570_v44 }
 0x750   : > { %v2515_v29 = vadd.f32 %v2513_v18, %v2501_v22  ;;  %v2502_v30 = vadd.f32 %v2500_v21, %v2491_v26  ;;  %3717 = vmatpush3.msra.mxu1 %v2570_v44  ;;  %v3048_v44 = vld [vmem:[%s5038_s17 + $0x30] sm:$0xff] }
 0x751   : > { %3718 = vmatprep.subr.mxu1 %v2569_v46 }
 0x752   : > { %v2535_v34 = vmul.f32 %v2533_v27, %v2515_v29  ;;  %v2516_v36 = vadd.f32 %v2514_v43, %v2502_v30  ;;  %3719 = vmatpush3.msra.mxu1 %v2569_v46  ;;  %v3057_v30 = vld [vmem:[%s5038_s17 + $0x78] sm:$0xff]  ;;  %v3047_v46 = vld [vmem:[%s5038_s17 + $0x28] sm:$0xff] }
 0x753   : > { %3720 = vmatprep.subr.mxu1 %v2568_v38 }
 0x754   : > { %v2537_v39 = vmul.f32 %v2535_v34, %v2535_v34  ;;  %v2536_v40 = vmul.f32 %v2534_v31, %v2516_v36  ;;  %3721 = vmatpush3.msra.mxu1 %v2568_v38  ;;  %v3056_v31 = vld [vmem:[%s5038_s17 + $0x70] sm:$0xff]  ;;  %v3054_v36 = vld [vmem:[%s5038_s17 + $0x60] sm:$0xff] }
 0x755   : > { %3722 = vmatprep.subr.mxu1 %v2567_v48  ;;  %v3046_v38 = vld [vmem:[%s5038_s17 + $0x20] sm:$0xff] }
 0x756   : > { %2539 = vadd.xlane.f32.xlu1 %v2537_v39  ;;  %v2538_v41 = vmul.f32 %v2536_v40, %v2536_v40  ;;  %3723 = vmatpush3.msra.mxu1 %v2567_v48  ;;  %v3053_v39 = vld [vmem:[%s5038_s17 + $0x58] sm:$0xff] }
 0x757   : > { %3724 = vmatprep.subr.mxu1 %v2566_v16  ;;  %v3045_v48 = vld [vmem:[%s5038_s17 + $0x18] sm:$0xff] }
 0x758   : > { %2541 = vadd.xlane.f32.xlu0 %v2538_v41  ;;  %3725 = vmatpush3.msra.mxu1 %v2566_v16  ;;  %v3051_v41 = vld [vmem:[%s5038_s17 + $0x48] sm:$0xff]  ;;  %v3044_v16 = vld [vmem:[%s5038_s17 + $0x10] sm:$0xff] }
 0x759   : > { %3726 = vmatprep.subr.mxu1 %v2565_v51 }
 0x75a   : > { %3727 = vmatpush3.msra.mxu1 %v2565_v51  ;;  %v3043_v51 = vld [vmem:[%s5038_s17 + $0x8] sm:$0xff] }
 0x75b   : > { %3728 = vmatprep.subr.mxu1 %v2564_v52 }
 0x75c   : > { %3729 = vmatpush3.msra.mxu1 %v2564_v52  ;;  %v3042_v52 = vld [vmem:[%s5038_s17] sm:$0xff] }
 0x75d   : > { %3730 = vmatprep.subr.mxu1 %v2563_v53 }
 0x75e   : > { %3731 = vmatpush3.msra.mxu1 %v2563_v53 }
 0x75f   : > { %3732 = vmatprep.subr.mxu1 %v2562_v55 }
 0x760   : > { %3733 = vmatpush3.msra.mxu1 %v2562_v55 }
 0x761   : > { %3734 = vmatprep.subr.mxu1 %v2561_v57 }
 0x762   : > { %3735 = vmatpush3.msra.mxu1 %v2561_v57 }
 0x785   : > { %2654 = vxpose.xlu0.b32.start [1/2] (short) (narrow) %v2652_v58, 64 }
 0x789   : > { %2655 = vxpose.xlu0.b32.end [2/2] (short) (narrow) %v2653_v37, 64 }
 0x7df   : > { %v2540_v49 = vpop.xlane.xlu1 %2539 }
 0x7e0   : > { %v2544_v50 = vmul.f32 0.0078125, %v2540_v49 }
 0x7e1   : > { %v2542_v56 = vpop.xlane.xlu0 %2541 }
 0x7e2   : > { %v2546_v42 = vadd.f32 1e-05, %v2544_v50  ;;  %v2545_v59 = vmul.f32 0.0078125, %v2542_v56 }
 0x7e4   : > { %4003 = vrsqrt.f32 %v2546_v42  ;;  %v2547_v60 = vadd.f32 1e-05, %v2545_v59 }
 0x7e6   : > { %4005 = vrsqrt.f32 %v2547_v60 }
 0x7f1   : > { %v4004_v32 = vpop.eup %4003 }
 0x7f2   : > { %v2550_v35 = vmul.f32 %v4004_v32, %v2535_v34  ;;  %v3055_v34 = vld [vmem:[%s5038_s17 + $0x68] sm:$0xff] }
 0x7f3   : > { %v4006_v23 = vpop.eup %4005 }
 0x7f4   : > { %v2551_v11 = vmul.f32 %v4006_v23, %v2536_v40  ;;  %v2559_v24 = vmul.f32 %v3411_v28, %v2550_v35  ;;  %v3052_v40 = vld [vmem:[%s5038_s17 + $0x50] sm:$0xff] }
 0x7f6   : > { %v2560_v20 = vmul.f32 %v3411_v28, %v2551_v11  ;;  %3736 = vmatprep.mubr.f32.mxu1 %v2559_v24 }
 0x7f8   : > { %3737 = vmatmul.mubr.f32.vlgmr.msra.gmra.mxu1 %v2560_v20 }
 0x801   : > { %v2670_v17 = vpop.trf.xlu0 }
 0x802   : > { %3743 = vmatprep.mubr.msk.f32.mxu0 %vm1864_vm7, %v2670_v17 }
 0x805   : > { %v2671_v47 = vpop.trf.xlu0 }
 0x809   : > { %v2672_v61 = vpop.trf.xlu0 }
 0x80d   : > { %v2673_v62 = vpop.trf.xlu0 }
 0x811   : > { %v2674_v0 = vpop.trf.xlu0 }
 0x815   : > { %v2675_v54 = vpop.trf.xlu0 }
 0x819   : > { %v2676_v2 = vpop.trf.xlu0 }
 0x81d   : > { %v2677_v3 = vpop.trf.xlu0 }
 0x8b8   : > { %v3738_v63 = vpop.f32.mrf.mxu1 }
 0x8b9   : > { %2861 = vrot.lane.b32.xlu1 %v3738_v63, %s4314_s22  ;;  %3739 = vmatprep.subr.mxu0 %v3738_v63 }
 0x8ba   : > { %v2643_v1 = vpop.f32.mrf.mxu1  ;;  %3740 = vmatpush3.msra.mxu0 %v3738_v63 }
 0x8bb   : > { %3741 = vmatprep.subr.mxu0 %v2643_v1 }
 0x8bc   : > { %3742 = vmatpush3.msra.mxu0 %v2643_v1 }
 0x8bd   : > { %2859 = vrot.lane.b32.xlu1 %v2643_v1, %s4314_s22  ;;  %3744 = vmatmul.mubr.msk.f32.vlgmr.msra.gmra.mxu0 %vm1864_vm7, %v2671_v47  ;;  %v3428_v1 = vld [vmem:[%s5039_s18] ss:$0 sm:$0xff] }
 0x8be   : > { %3746 = vmatprep.mubr.msk.f32.mxu0 %vm1864_vm7, %v2672_v61 }
 0x8c1   : > { %3747 = vmatmul.mubr.msk.f32.gmra.mxu0 %vm1864_vm7, %v2673_v62 }
 0x8c2   : > { %3749 = vmatprep.mubr.msk.f32.mxu0 %vm1864_vm7, %v2674_v0 }
 0x8c5   : > { %3750 = vmatmul.mubr.msk.f32.gmra.mxu0 %vm1864_vm7, %v2675_v54 }
 0x8c6   : > { %3752 = vmatprep.mubr.msk.f32.mxu0 %vm1864_vm7, %v2676_v2 }
 0x8c9   : > { %3753 = vmatmul.mubr.msk.f32.gmra.mxu0 %vm1864_vm7, %v2677_v3 }
 0x8e6   : > { %2825 = vxpose.xlu1.b32.start [1/2] (short) (narrow) %v2823_v4, 64 }
 0x8ea   : > { %2826 = vxpose.xlu1.b32.end [2/2] (short) (narrow) %v2824_v5, 64 }
 0x92b   : > { %v2862_v7 = vpop.permute.xlu1 %2861 }
 0x92c   : > { %3755 = vmatprep.subr.mxu0 %v2862_v7 }
 0x92d   : > { %3756 = vmatpush3.msra.mxu0 %v2862_v7 }
 0x92f   : > { %v2860_v8 = vpop.permute.xlu1 %2859 }
 0x930   : > { %3757 = vmatprep.subr.mxu0 %v2860_v8 }
 0x931   : > { %3758 = vmatpush3.msra.mxu0 %v2860_v8 }
 0x932   : > { %3771 = vmatprep.subr.mxu0 %v3057_v30 }
 0x962   : > { %v2841_v9 = vpop.trf.xlu1 }
 0x963   : > { %3759 = vmatprep.mubr.msk.f32.mxu0 %vm1864_vm7, %v2841_v9 }
 0x966   : > { %v2842_v10 = vpop.trf.xlu1 }
 0x967   : > { %3760 = vmatmul.mubr.msk.f32.vlgmr.msra.gmra.mxu0 %vm1864_vm7, %v2842_v10 }
 0x968   : > { %3772 = vmatpush3.msra.mxu0 %v3057_v30 }
 0x969   : > { %3773 = vmatprep.subr.mxu0 %v3056_v31 }
 0x96a   : > { %v2843_v6 = vpop.trf.xlu1  ;;  %3774 = vmatpush3.msra.mxu0 %v3056_v31 }
 0x96b   : > { %3762 = vmatprep.mubr.msk.f32.mxu0 %vm1864_vm7, %v2843_v6  ;;  %3775 = vmatprep.subr.mxu0 %v3055_v34 }
 0x96c   : > { %3776 = vmatpush3.msra.mxu0 %v3055_v34 }
 0x96d   : > { %3777 = vmatprep.subr.mxu0 %v3054_v36 }
 0x96e   : > { %v2844_v12 = vpop.trf.xlu1  ;;  %3778 = vmatpush3.msra.mxu0 %v3054_v36 }
 0x96f   : > { %3763 = vmatmul.mubr.msk.f32.gmra.mxu0 %vm1864_vm7, %v2844_v12  ;;  %3779 = vmatprep.subr.mxu0 %v3053_v39 }
 0x970   : > { %3780 = vmatpush3.msra.mxu0 %v3053_v39 }
 0x971   : > { %3781 = vmatprep.subr.mxu0 %v3052_v40 }
 0x972   : > { %v2845_v13 = vpop.trf.xlu1  ;;  %3782 = vmatpush3.msra.mxu0 %v3052_v40 }
 0x973   : > { %3765 = vmatprep.mubr.msk.f32.mxu0 %vm1864_vm7, %v2845_v13  ;;  %3783 = vmatprep.subr.mxu0 %v3051_v41 }
 0x974   : > { %3784 = vmatpush3.msra.mxu0 %v3051_v41 }
 0x975   : > { %3785 = vmatprep.subr.mxu0 %v3050_v19 }
 0x976   : > { %v2846_v14 = vpop.trf.xlu1  ;;  %3786 = vmatpush3.msra.mxu0 %v3050_v19 }
 0x977   : > { %3766 = vmatmul.mubr.msk.f32.gmra.mxu0 %vm1864_vm7, %v2846_v14  ;;  %3787 = vmatprep.subr.mxu0 %v3049_v33 }
 0x978   : > { %3788 = vmatpush3.msra.mxu0 %v3049_v33 }
 0x979   : > { %3789 = vmatprep.subr.mxu0 %v3048_v44 }
 0x97a   : > { %v2847_v15 = vpop.trf.xlu1  ;;  %3790 = vmatpush3.msra.mxu0 %v3048_v44 }
 0x97b   : > { %3768 = vmatprep.mubr.msk.f32.mxu0 %vm1864_vm7, %v2847_v15  ;;  %3791 = vmatprep.subr.mxu0 %v3047_v46 }
 0x97c   : > { %3792 = vmatpush3.msra.mxu0 %v3047_v46 }
 0x97d   : > { %v3745_v45 = vpop.f32.mrf.mxu0  ;;  %3793 = vmatprep.subr.mxu0 %v3046_v38 }
 0x97e   : > { %v2848_v18 = vpop.trf.xlu1  ;;  %2816 = vst.msk [vmem:[#allocation5 + $0x8] sm:$0xff] %vm1040_vm1, %v3745_v45  ;;  %3794 = vmatpush3.msra.mxu0 %v3046_v38 }
 0x97f   : > { %3769 = vmatmul.mubr.msk.f32.gmra.mxu0 %vm1864_vm7, %v2848_v18  ;;  %v2776_v21 = vpop.f32.mrf.mxu0  ;;  %3795 = vmatprep.subr.mxu0 %v3045_v48 }
 0x980   : > { %2815 = vst.msk [vmem:[#allocation5] sm:$0xff] %vm1040_vm1, %v2776_v21  ;;  %3796 = vmatpush3.msra.mxu0 %v3045_v48 }
 0x981   : > { %v3748_v22 = vpop.f32.mrf.mxu0  ;;  %3797 = vmatprep.subr.mxu0 %v3044_v16 }
 0x982   : > { %2818 = vst.msk [vmem:[#allocation5 + $0x18] sm:$0xff] %vm1040_vm1, %v3748_v22  ;;  %3798 = vmatpush3.msra.mxu0 %v3044_v16 }
 0x983   : > { %v2786_v25 = vpop.f32.mrf.mxu0  ;;  %3799 = vmatprep.subr.mxu0 %v3043_v51 }
 0x984   : > { %2817 = vst.msk [vmem:[#allocation5 + $0x10] sm:$0xff] %vm1040_vm1, %v2786_v25  ;;  %3800 = vmatpush3.msra.mxu0 %v3043_v51 }
 0x985   : > { %v3751_v26 = vpop.f32.mrf.mxu0  ;;  %3801 = vmatprep.subr.mxu0 %v3042_v52 }
 0x986   : > { %2820 = vst.msk [vmem:[#allocation5 + $0x28] sm:$0xff] %vm1040_vm1, %v3751_v26  ;;  %3802 = vmatpush3.msra.mxu0 %v3042_v52 }
 0x987   : > { %v2796_v27 = vpop.f32.mrf.mxu0 }
 0x988   : > { %2819 = vst.msk [vmem:[#allocation5 + $0x20] sm:$0xff] %vm1040_vm1, %v2796_v27 }
 0x989   : > { %v3754_v43 = vpop.f32.mrf.mxu0 }
 0x98a   : > { %2822 = vst.msk [vmem:[#allocation5 + $0x38] sm:$0xff] %vm1040_vm1, %v3754_v43 }
 0x98b   : > { %v2806_v29 = vpop.f32.mrf.mxu0 }
 0x98c   : > { %2821 = vst.msk [vmem:[#allocation5 + $0x30] sm:$0xff] %vm1040_vm1, %v2806_v29 }
 0xa27   : > { %v3761_v53 = vpop.f32.mrf.mxu0 }
 0xa28   : > { %3004 = vrot.lane.b32.xlu0 %v3761_v53, %s4314_s22 }
 0xa29   : > { %v2955_v55 = vpop.f32.mrf.mxu0 }
 0xa2a   : > { %3002 = vrot.lane.b32.xlu1 %v2955_v55, %s4314_s22 }
 0xa2f   : > { %v3764_v57 = vpop.f32.mrf.mxu0 }
 0xa30   : > { %3008 = vrot.lane.b32.xlu1 %v3764_v57, %s4314_s22 }
 0xa31   : > { %v2965_v58 = vpop.f32.mrf.mxu0 }
 0xa34   : > { %3006 = vrot.lane.b32.xlu1 %v2965_v58, %s4314_s22 }
 0xa37   : > { %v3767_v37 = vpop.f32.mrf.mxu0 }
 0xa39   : > { %v2975_v49 = vpop.f32.mrf.mxu0 }
 0xa3a   : > { %3010 = vrot.lane.b32.xlu1 %v2975_v49, %s4314_s22 }
 0xa3e   : > { %3012 = vrot.lane.b32.xlu1 %v3767_v37, %s4314_s22 }
 0xa3f   : > { %v3770_v50 = vpop.f32.mrf.mxu0 }
 0xa41   : > { %v2985_v56 = vpop.f32.mrf.mxu0 }
 0xa42   : > { %3016 = vrot.lane.b32.xlu1 %v3770_v50, %s4314_s22  ;;  %3014 = vrot.lane.b32.xlu0 %v2985_v56, %s4314_s22 }
 0xa9a   : > { %v3005_v42 = vpop.permute.xlu0 %3004 }
 0xa9b   : > { %3027 = vst.msk [vmem:[#allocation5 + $0x8] sm:$0xff] %vm1328_vm2, %v3005_v42 }
 0xa9c   : > { %v3003_v59 = vpop.permute.xlu1 %3002 }
 0xa9d   : > { %3026 = vst.msk [vmem:[#allocation5] sm:$0xff] %vm1328_vm2, %v3003_v59 }
 0xaa2   : > { %v3009_v60 = vpop.permute.xlu1 %3008  ;;  %v3035_v28 = vld [vmem:[#allocation5 + $0x8] sm:$0xff] }
 0xaa3   : > { %3029 = vst.msk [vmem:[#allocation5 + $0x18] sm:$0xff] %vm1328_vm2, %v3009_v60 }
 0xaa4   : > { %v3034_v32 = vld [vmem:[#allocation5] sm:$0xff] }
 0xaa5   : > { %3803 = vmatprep.mubr.f32.mxu0 %v3034_v32 }
 0xaa6   : > { %3804 = vmatmul.mubr.f32.vlgmr.msra.gmra.mxu0 %v3035_v28  ;;  %v3007_v35 = vpop.permute.xlu1 %3006 }
 0xaa7   : > { %3028 = vst.msk [vmem:[#allocation5 + $0x10] sm:$0xff] %vm1328_vm2, %v3007_v35 }
 0xaaa   : > { %v3037_v24 = vld [vmem:[#allocation5 + $0x18] sm:$0xff] }
 0xaac   : > { %v3011_v23 = vpop.permute.xlu1 %3010 }
 0xaad   : > { %3030 = vst.msk [vmem:[#allocation5 + $0x20] sm:$0xff] %vm1328_vm2, %v3011_v23 }
 0xaae   : > { %v3036_v11 = vld [vmem:[#allocation5 + $0x10] sm:$0xff] }
 0xaaf   : > { %3806 = vmatprep.mubr.f32.mxu0 %v3036_v11 }
 0xab0   : > { %3807 = vmatmul.mubr.f32.gmra.mxu0 %v3037_v24  ;;  %v3013_v20 = vpop.permute.xlu1 %3012 }
 0xab1   : > { %3031 = vst.msk [vmem:[#allocation5 + $0x28] sm:$0xff] %vm1328_vm2, %v3013_v20 }
 0xab4   : > { %v3017_v17 = vpop.permute.xlu1 %3016  ;;  %v3015_v47 = vpop.permute.xlu0 %3014  ;;  %v3038_v61 = vld [vmem:[#allocation5 + $0x20] sm:$0xff] }
 0xab5   : > { %3033 = vst.msk [vmem:[#allocation5 + $0x38] sm:$0xff] %vm1328_vm2, %v3017_v17  ;;  %3032 = vst.msk [vmem:[#allocation5 + $0x30] sm:$0xff] %vm1328_vm2, %v3015_v47  ;;  %3809 = vmatprep.mubr.f32.mxu0 %v3038_v61 }
 0xab8   : > { %v3039_v62 = vld [vmem:[#allocation5 + $0x28] sm:$0xff] }
 0xab9   : > { %3810 = vmatmul.mubr.f32.gmra.mxu0 %v3039_v62 }
 0xabc   : > { %v3040_v63 = vld [vmem:[#allocation5 + $0x30] sm:$0xff]  ;;  %v3041_v0 = vld [vmem:[#allocation5 + $0x38] sm:$0xff] }
 0xabd   : > { %3812 = vmatprep.mubr.f32.mxu0 %v3040_v63 }
 0xabe   : > { %3813 = vmatmul.mubr.f32.gmra.mxu0 %v3041_v0 }
 0xb66   : > { %v3805_v54 = vpop.f32.mrf.mxu0 }
 0xb67   : > { %v3137_v2 = vadd.f32 %v3805_v54, %v3428_v1 }
 0xb68   : > { %v3131_v3 = vpop.f32.mrf.mxu0 }
 0xb69   : > { %3171 = vst.msk [vmem:[%s765_s3 + $0x8] sm:$0xff] %vm785_vm0, %v3137_v2  ;;  %v3132_v4 = vadd.f32 %v3428_v1, %v3131_v3 }
 0xb6b   : > { %3170 = vst.msk [vmem:[%s765_s3] sm:$0xff] %vm785_vm0, %v3132_v4 }
 0xb70   : > { %v3808_v5 = vpop.f32.mrf.mxu0 }
 0xb71   : > { %v3147_v7 = vadd.f32 %v3808_v5, %v3428_v1 }
 0xb72   : > { %v3141_v8 = vpop.f32.mrf.mxu0 }
 0xb73   : > { %3173 = vst.msk [vmem:[%s765_s3 + $0x18] sm:$0xff] %vm785_vm0, %v3147_v7  ;;  %v3142_v9 = vadd.f32 %v3428_v1, %v3141_v8 }
 0xb75   : > { %3172 = vst.msk [vmem:[%s765_s3 + $0x10] sm:$0xff] %vm785_vm0, %v3142_v9 }
 0xb79   : > { %v3811_v10 = vpop.f32.mrf.mxu0 }
 0xb7a   : > { %v3157_v6 = vadd.f32 %v3811_v10, %v3428_v1 }
 0xb7b   : > { %v3151_v12 = vpop.f32.mrf.mxu0 }
 0xb7c   : > { %3175 = vst.msk [vmem:[%s765_s3 + $0x28] sm:$0xff] %vm785_vm0, %v3157_v6  ;;  %v3152_v13 = vadd.f32 %v3428_v1, %v3151_v12 }
 0xb7e   : > { %3174 = vst.msk [vmem:[%s765_s3 + $0x20] sm:$0xff] %vm785_vm0, %v3152_v13  ;;  %v3814_v14 = vpop.f32.mrf.mxu0 }
 0xb7f   : > { %v3167_v15 = vadd.f32 %v3814_v14, %v3428_v1 }
 0xb80   : > { %v3161_v45 = vpop.f32.mrf.mxu0 }
 0xb81   : > { %3177 = vst.msk [vmem:[%s765_s3 + $0x38] sm:$0xff] %vm785_vm0, %v3167_v15  ;;  %v3162_v18 = vadd.f32 %v3428_v1, %v3161_v45 }
 0xb83   : > { %3176 = vst.msk [vmem:[%s765_s3 + $0x30] sm:$0xff] %vm785_vm0, %v3162_v18 }
 0xb84 PF: > { %s5075_s24 = sld [smem:[#allocation29_spill]] }
 0xb8a   : > { %s38_s23 = sadd.s32 1, %s5075_s24  }
 0xb8b   : > { %p35_p13 = scmp.ge.s32.totalorder %s38_s23, 4  }
 0xb8d   :  { %37 = sbr.rel (!%p35_p13) target bundleno = 12 (0xc), region = 173 }
 0xb92   :  { %3199 = vsyncpa [#allocation8], 1 }
 0xb93   :  { %3201 = vsyncpa [#allocation8 + $0x1], 1 }
 0xb94   :  { %3202 = vsyncpa [#allocation10], 1 }
 0xb95   :  { %3203 = vsyncpa [#allocation13], 1 }
 0xb96   :  { %3204 = vsyncpa [#allocation16], 1 }
 0xb97   :  { %3205 = vsyncpa [#allocation19], 1 }
 0xb98   :  { %3206 = vsyncpa [#allocation22], 1 }

</bundles_post_ra>
